<compile_context>
chip_gen: v7x
topology: tpu7x:2x2x1
jax: 0.10.0
libtpu: 0.0.40
codegen_flags: <defaults>
</compile_context>

<pallas_src>
import functools

import jax
import jax.numpy as jnp
from jax.experimental import pallas as pl
from jax.experimental.pallas import tpu as pltpu

MM_TM = 256      # matmul row-tile cap
MM_TN = 256      # matmul lane-tile cap (full 256-wide MXU on v6e/v7x)
MM_TK = 512      # matmul K-tile cap
C3_TM = 128      # row tile of the shifted-window 3x3 conv kernel
EW_ROWS = 512    # elementwise row-tile cap
POOL_ROWS = 256  # maxpool row-tile cap


def _ru(x, m):
    return (x + m - 1) // m * m


def _pick_m(m, cap):
    """Row tiling: prefer a tile that divides m exactly (no pad => no output-slice copy)."""
    if m <= cap:
        mp = _ru(m, 8)
        return mp, mp
    for tm in range(min(2 * cap, _ru(m, 8)), cap // 2 - 1, -8):
        if m % tm == 0:
            return m, tm
    return _ru(m, cap), cap


def _pick_n(n):
    if n >= 128:
        npad = _ru(n, 128)
        for tn in range(min(MM_TN, npad), 127, -128):
            if npad % tn == 0:
                return npad, tn
        return npad, 128
    if n >= 64:
        return n, n           # full-dim lane block (Cout = 64)
    return 128, 128           # tiny widths (fc head) -> one lane tile


def _pick_k(k):
    if k < 128:
        kp = _ru(k, 8)
        return kp, kp         # single full-dim K block
    kp = _ru(k, 128)
    for tk in range(min(MM_TK, kp), 127, -128):
        if kp % tk == 0:
            return kp, tk
    return kp, 128


# ----------------------------------------------------------------------------
# Pallas kernels
# ----------------------------------------------------------------------------
def _mm_fused_kernel(a_ref, b_ref, s_ref, t_ref, *refs, act, has_res):
    """Tiled matmul (bf16 -> f32 acc) with fused scale/shift (+act) (+residual) epilogue."""
    if has_res:
        r_ref, o_ref, acc_ref = refs
    else:
        o_ref, acc_ref = refs

    @pl.when(pl.program_id(2) == 0)
    def _():
        acc_ref[...] = jnp.zeros_like(acc_ref)

    acc_ref[...] += jnp.dot(a_ref[...], b_ref[...],
                            preferred_element_type=jnp.float32)

    @pl.when(pl.program_id(2) == pl.num_programs(2) - 1)
    def _():
        y = acc_ref[...] * s_ref[...] + t_ref[...]
        if act == "relu":
            y = jnp.maximum(y, 0.0)
        elif act == "sigmoid":
            y = jax.nn.sigmoid(y)
        if has_res:
            y = y + r_ref[...]
        o_ref[...] = y.astype(o_ref.dtype)


def _conv3x3_kernel(a_lo_ref, a_hi_ref, b_ref, s_ref, t_ref, o_ref,
                    awin_ref, acat_ref, *, tm, cin_p, shifts, relu):
    """3x3/s1 conv: taps are static row shifts of the padded, row-flattened image.

    a_lo/a_hi are two consecutive TM-row blocks of the flattened image; the nine
    shifted (TM, cin_p) windows are assembled in VMEM and contracted in one matmul.
    """
    awin_ref[0:tm, :] = a_lo_ref[...]
    awin_ref[tm:2 * tm, :] = a_hi_ref[...]
    for tp, sh in enumerate(shifts):
        acat_ref[:, tp * cin_p:(tp + 1) * cin_p] = awin_ref[sh:sh + tm, :]
    y = jnp.dot(acat_ref[...], b_ref[...], preferred_element_type=jnp.float32)
    y = y * s_ref[...] + t_ref[...]
    if relu:
        y = jnp.maximum(y, 0.0)
    o_ref[...] = y.astype(o_ref.dtype)


def _bn_act_kernel(x_ref, s_ref, b_ref, o_ref, *, relu):
    y = x_ref[...] * s_ref[...] + b_ref[...]
    if relu:
        y = jnp.maximum(y, 0.0)
    o_ref[...] = y


def _add_kernel(a_ref, b_ref, o_ref):
    o_ref[...] = a_ref[...] + b_ref[...]


def _mask_combine_kernel(m_ref, t_ref, o_ref):
    o_ref[...] = (1.0 + jax.nn.sigmoid(m_ref[...])) * t_ref[...]


def _max_reduce_kernel(p_ref, o_ref):
    o_ref[...] = jnp.max(p_ref[...], axis=0)


def _mean_reduce_kernel(x_ref, o_ref):
    o_ref[...] = jnp.mean(x_ref[...], axis=1)


# ----------------------------------------------------------------------------
# Fused matmul wrapper (traced inside jitted mid-level ops)
# ----------------------------------------------------------------------------
def _fused_mm(a, b, scale, shift, residual, act):
    """act(a @ b * scale + shift) (+ residual).  a,b: bf16; scale/shift per column."""
    M, K = a.shape
    N = b.shape[1]
    Mp, TM = _pick_m(M, MM_TM)
    Np, TN = _pick_n(N)
    Kp, TK = _pick_k(K)
    a_p = a if (Mp == M and Kp == K) else jnp.pad(a, ((0, Mp - M), (0, Kp - K)))
    b_p = b if (Kp == K and Np == N) else jnp.pad(b, ((0, Kp - K), (0, Np - N)))
    s_p = jnp.pad(scale.reshape(1, -1).astype(jnp.float32), ((0, 0), (0, Np - N)))
    t_p = jnp.pad(shift.reshape(1, -1).astype(jnp.float32), ((0, 0), (0, Np - N)))
    in_specs = [
        pl.BlockSpec((TM, TK), lambda i, j, k: (i, k)),
        pl.BlockSpec((TK, TN), lambda i, j, k: (k, j)),
        pl.BlockSpec((1, TN), lambda i, j, k: (0, j)),
        pl.BlockSpec((1, TN), lambda i, j, k: (0, j)),
    ]
    args = [a_p, b_p, s_p, t_p]
    has_res = residual is not None
    if has_res:
        r_p = residual.astype(jnp.float32)
        if Mp != M or Np != N:
            r_p = jnp.pad(r_p, ((0, Mp - M), (0, Np - N)))
        in_specs.append(pl.BlockSpec((TM, TN), lambda i, j, k: (i, j)))
        args.append(r_p)
    out = pl.pallas_call(
        functools.partial(_mm_fused_kernel, act=act, has_res=has_res),
        out_shape=jax.ShapeDtypeStruct((Mp, Np), jnp.float32),
        grid_spec=pltpu.PrefetchScalarGridSpec(
            num_scalar_prefetch=0,
            grid=(Mp // TM, Np // TN, Kp // TK),
            in_specs=in_specs,
            out_specs=pl.BlockSpec((TM, TN), lambda i, j, k: (i, j)),
            scratch_shapes=[pltpu.VMEM((TM, TN), jnp.float32)]),
        compiler_params=pltpu.CompilerParams(
            dimension_semantics=("parallel", "parallel", "arbitrary")),
    )(*args)
    if Mp != M or Np != N:
        out = out[:M, :N]
    return out


# ----------------------------------------------------------------------------
# Mid-level NN ops (jitted so each unique shape compiles exactly once)
# ----------------------------------------------------------------------------
@functools.partial(jax.jit, static_argnames=("relu",))
def conv1x1_bn(x, w, scale, shift, residual=None, *, relu=False):
    """1x1 conv + fused BN scale/shift (+ReLU) (+residual add)."""
    N, H, W, Cin = x.shape
    Cout = w.shape[1]
    a = x.reshape(N * H * W, Cin).astype(jnp.bfloat16)
    r = None if residual is None else residual.reshape(N * H * W, Cout)
    out = _fused_mm(a, w, scale, shift, r, "relu" if relu else None)
    return out.reshape(N, H, W, Cout)


@functools.partial(jax.jit, static_argnames=("relu",))
def conv3x3s1_bn(x, w9, scale, shift, *, relu):
    """3x3 / stride-1 / pad-1 conv via the shifted-window tap kernel, fused BN(+ReLU).

    w9: (9*cin_p, Cout) bf16 with (kh, kw) tap-major rows, Cin zero-padded to cin_p.
    """
    N, H, W, Cin = x.shape
    Cout = w9.shape[1]
    cin_p = w9.shape[0] // 9
    Hp, Wp = H + 2, W + 2
    TM = C3_TM
    assert 2 * Wp + 2 <= TM, "image too wide for the shifted-window conv tile"
    xp = jnp.pad(x.astype(jnp.bfloat16),
                 ((0, 0), (1, 1), (1, 1), (0, cin_p - Cin)))
    M = N * Hp * Wp
    Mp = _ru(M, TM)
    Xf = xp.reshape(M, cin_p)
    top = Wp + 1
    XL = jnp.pad(Xf, ((top, Mp + TM - M - top), (0, 0)))     # rows = Mp + TM
    Np, TN = _pick_n(Cout)
    b_p = w9 if Np == Cout else jnp.pad(w9, ((0, 0), (0, Np - Cout)))
    s_p = jnp.pad(scale.reshape(1, -1).astype(jnp.float32), ((0, 0), (0, Np - Cout)))
    t_p = jnp.pad(shift.reshape(1, -1).astype(jnp.float32), ((0, 0), (0, Np - Cout)))
    shifts = tuple(kh * Wp + kw for kh in range(3) for kw in range(3))
    out = pl.pallas_call(
        functools.partial(_conv3x3_kernel, tm=TM, cin_p=cin_p,
                          shifts=shifts, relu=relu),
        out_shape=jax.ShapeDtypeStruct((Mp, Np), jnp.float32),
        grid_spec=pltpu.PrefetchScalarGridSpec(
            num_scalar_prefetch=0,
            grid=(Mp // TM, Np // TN),
            in_specs=[
                pl.BlockSpec((TM, cin_p), lambda i, j: (i, 0)),
                pl.BlockSpec((TM, cin_p), lambda i, j: (i + 1, 0)),
                pl.BlockSpec((9 * cin_p, TN), lambda i, j: (0, j)),
                pl.BlockSpec((1, TN), lambda i, j: (0, j)),
                pl.BlockSpec((1, TN), lambda i, j: (0, j)),
            ],
            out_specs=pl.BlockSpec((TM, TN), lambda i, j: (i, j)),
            scratch_shapes=[pltpu.VMEM((2 * TM, cin_p), jnp.bfloat16),
                            pltpu.VMEM((TM, 9 * cin_p), jnp.bfloat16)]),
        compiler_params=pltpu.CompilerParams(
            dimension_semantics=("parallel", "parallel")),
    )(XL, XL, b_p, s_p, t_p)
    out = out[:M, :Cout].reshape(N, Hp, Wp, Cout)
    return out[:, 1:H + 1, 1:W + 1, :]


@functools.partial(jax.jit, static_argnames=("ksize", "stride", "pad", "relu"))
def conv_im2col_bn(x, w2d, scale, shift, *, ksize, stride, pad, relu):
    """General KxK conv via im2col (only used for the 7x7 stem and the 3 stride-2 3x3s)."""
    N, H, W, Cin = x.shape
    Cout = w2d.shape[1]
    xb = x.astype(jnp.bfloat16)
    if pad:
        xb = jnp.pad(xb, ((0, 0), (pad, pad), (pad, pad), (0, 0)))
    Hp, Wp = xb.shape[1], xb.shape[2]
    OH = (Hp - ksize) // stride + 1
    OW = (Wp - ksize) // stride + 1
    cols = []
    for kh in range(ksize):
        for kw in range(ksize):
            cols.append(xb[:, kh:kh + stride * (OH - 1) + 1:stride,
                           kw:kw + stride * (OW - 1) + 1:stride, :])
    patches = jnp.concatenate(cols, axis=-1).reshape(N * OH * OW, ksize * ksize * Cin)
    out = _fused_mm(patches, w2d, scale, shift, None, "relu" if relu else None)
    return out.reshape(N, OH, OW, Cout)


@functools.partial(jax.jit, static_argnames=("relu",))
def bn_act(x, scale, shift, *, relu):
    """Standalone inference BatchNorm (pre-computed scale/shift) + optional ReLU."""
    N, H, W, C = x.shape
    M = N * H * W
    Mp, tile = _pick_m(M, EW_ROWS)
    xp = x.reshape(M, C)
    if Mp != M:
        xp = jnp.pad(xp, ((0, Mp - M), (0, 0)))
    out = pl.pallas_call(
        functools.partial(_bn_act_kernel, relu=relu),
        out_shape=jax.ShapeDtypeStruct((Mp, C), x.dtype),
        grid=(Mp // tile,),
        in_specs=[pl.BlockSpec((tile, C), lambda i: (i, 0)),
                  pl.BlockSpec((1, C), lambda i: (0, 0)),
                  pl.BlockSpec((1, C), lambda i: (0, 0))],
        out_specs=pl.BlockSpec((tile, C), lambda i: (i, 0)),
        compiler_params=pltpu.CompilerParams(dimension_semantics=("parallel",)),
    )(xp, scale.reshape(1, C), shift.reshape(1, C))
    if Mp != M:
        out = out[:M]
    return out.reshape(N, H, W, C)


@jax.jit
def ew_add(a, b):
    N, H, W, C = a.shape
    M = N * H * W
    Mp, tile = _pick_m(M, EW_ROWS)
    ap, bp = a.reshape(M, C), b.reshape(M, C)
    if Mp != M:
        ap = jnp.pad(ap, ((0, Mp - M), (0, 0)))
        bp = jnp.pad(bp, ((0, Mp - M), (0, 0)))
    out = pl.pallas_call(
        _add_kernel,
        out_shape=jax.ShapeDtypeStruct((Mp, C), a.dtype),
        grid=(Mp // tile,),
        in_specs=[pl.BlockSpec((tile, C), lambda i: (i, 0)),
                  pl.BlockSpec((tile, C), lambda i: (i, 0))],
        out_specs=pl.BlockSpec((tile, C), lambda i: (i, 0)),
        compiler_params=pltpu.CompilerParams(dimension_semantics=("parallel",)),
    )(ap, bp)
    if Mp != M:
        out = out[:M]
    return out.reshape(N, H, W, C)


@jax.jit
def mask_combine(mask, trunk):
    """(1 + sigmoid(mask)) * trunk, sigmoid fused in-kernel."""
    N, H, W, C = trunk.shape
    M = N * H * W
    Mp, tile = _pick_m(M, EW_ROWS)
    mp, tp = mask.reshape(M, C), trunk.reshape(M, C)
    if Mp != M:
        mp = jnp.pad(mp, ((0, Mp - M), (0, 0)))
        tp = jnp.pad(tp, ((0, Mp - M), (0, 0)))
    out = pl.pallas_call(
        _mask_combine_kernel,
        out_shape=jax.ShapeDtypeStruct((Mp, C), trunk.dtype),
        grid=(Mp // tile,),
        in_specs=[pl.BlockSpec((tile, C), lambda i: (i, 0)),
                  pl.BlockSpec((tile, C), lambda i: (i, 0))],
        out_specs=pl.BlockSpec((tile, C), lambda i: (i, 0)),
        compiler_params=pltpu.CompilerParams(dimension_semantics=("parallel",)),
    )(mp, tp)
    if Mp != M:
        out = out[:M]
    return out.reshape(N, H, W, C)


@jax.jit
def maxpool3x3s2(x):
    """MaxPool2d(kernel_size=3, stride=2, padding=1), -inf padding like PyTorch."""
    N, H, W, C = x.shape
    xp = jnp.pad(x, ((0, 0), (1, 1), (1, 1), (0, 0)), constant_values=float("-inf"))
    OH = (H + 2 - 3) // 2 + 1
    OW = (W + 2 - 3) // 2 + 1
    views = [xp[:, kh:kh + 2 * (OH - 1) + 1:2, kw:kw + 2 * (OW - 1) + 1:2, :]
             .reshape(N * OH * OW, C)
             for kh in range(3) for kw in range(3)]
    stacked = jnp.stack(views, axis=0)                   # (9, M, C)
    M = N * OH * OW
    Mp, tile = _pick_m(M, POOL_ROWS)
    if Mp != M:
        stacked = jnp.pad(stacked, ((0, 0), (0, Mp - M), (0, 0)))
    out = pl.pallas_call(
        _max_reduce_kernel,
        out_shape=jax.ShapeDtypeStruct((Mp, C), x.dtype),
        grid=(Mp // tile,),
        in_specs=[pl.BlockSpec((9, tile, C), lambda i: (0, i, 0))],
        out_specs=pl.BlockSpec((tile, C), lambda i: (i, 0)),
        compiler_params=pltpu.CompilerParams(dimension_semantics=("parallel",)),
    )(stacked)
    if Mp != M:
        out = out[:M]
    return out.reshape(N, OH, OW, C)


@jax.jit
def global_avgpool(x):
    """AvgPool over the full (7x7) map -> (N, C)."""
    N, H, W, C = x.shape
    return pl.pallas_call(
        _mean_reduce_kernel,
        out_shape=jax.ShapeDtypeStruct((N, C), x.dtype),
        grid=(1,),
        in_specs=[pl.BlockSpec((N, H * W, C), lambda i: (0, 0, 0))],
        out_specs=pl.BlockSpec((N, C), lambda i: (0, 0)),
    )(x.reshape(N, H * W, C))


def _interp_mat(out_n, in_n):
    """Bilinear (align_corners=True) 1-D interpolation matrix (out_n, in_n), f32."""
    if out_n == in_n:
        return jnp.eye(out_n, dtype=jnp.float32)
    pos = jnp.arange(out_n, dtype=jnp.float32) * (in_n - 1) / max(out_n - 1, 1)
    lo = jnp.floor(pos).astype(jnp.int32)
    hi = jnp.minimum(lo + 1, in_n - 1)
    frac = pos - lo.astype(jnp.float32)
    return (jax.nn.one_hot(lo, in_n, dtype=jnp.float32) * (1.0 - frac)[:, None]
            + jax.nn.one_hot(hi, in_n, dtype=jnp.float32) * frac[:, None])


@jax.jit
def upsample_add(x, skip):
    """Bilinear (align_corners=True) upsample of x to skip's spatial size, plus skip.

    Expressed as a single interpolation-matrix matmul (kron(R, C)) through the fused
    MXU kernel; the skip-add rides the residual epilogue.
    """
    N, H, W, C = x.shape
    _, OH, OW, _ = skip.shape
    A = jnp.kron(_interp_mat(OH, H), _interp_mat(OW, W)).astype(jnp.bfloat16)
    ones = jnp.ones((C,), jnp.float32)
    zeros = jnp.zeros((C,), jnp.float32)
    outs = []
    for n in range(N):
        xn = x[n].reshape(H * W, C).astype(jnp.bfloat16)
        rn = skip[n].reshape(OH * OW, C)
        outs.append(_fused_mm(A, xn, ones, zeros, rn, None))
    return jnp.stack(outs, axis=0).reshape(N, OH, OW, C)


@jax.jit
def fc_sigmoid(feat, w, bias):
    """Final Linear + bias + sigmoid, fused into the matmul epilogue."""
    a = feat.astype(jnp.bfloat16)
    ones = jnp.ones((w.shape[1],), jnp.float32)
    return _fused_mm(a, w, ones, bias, None, "sigmoid")


# ----------------------------------------------------------------------------
# Parameters (deterministic synthetic init, shapes from the module __init__)
# ----------------------------------------------------------------------------
class ParamGen:
    def __init__(self, seed=42):
        self._key = jax.random.PRNGKey(seed)
        self._n = 0

    def _next(self):
        self._n += 1
        return jax.random.fold_in(self._key, self._n)

    def _conv(self, kh, kw, cin, cout):
        std = (1.0 / (kh * kw * cin)) ** 0.5
        return jax.random.normal(self._next(), (kh, kw, cin, cout), jnp.float32) * std

    def conv1x1(self, cin, cout):
        return self._conv(1, 1, cin, cout).reshape(cin, cout).astype(jnp.bfloat16)

    def conv3x3_tap(self, cin, cout):
        w = self._conv(3, 3, cin, cout)
        cin_p = _ru(cin, 128)
        w = jnp.pad(w, ((0, 0), (0, 0), (0, cin_p - cin), (0, 0)))
        return w.reshape(9 * cin_p, cout).astype(jnp.bfloat16)

    def conv_k(self, k, cin, cout):
        return self._conv(k, k, cin, cout).reshape(k * k * cin, cout).astype(jnp.bfloat16)

    def bn(self, c, eps=1e-5):
        gamma = jnp.ones((c,), jnp.float32)
        beta = jnp.zeros((c,), jnp.float32)
        mean = jnp.zeros((c,), jnp.float32)
        var = jnp.ones((c,), jnp.float32)
        scale = gamma / jnp.sqrt(var + eps)
        return (scale, beta - mean * scale)

    def identity(self, c):
        return (jnp.ones((c,), jnp.float32), jnp.zeros((c,), jnp.float32))

    def linear(self, cin, cout):
        std = (1.0 / cin) ** 0.5
        w = (jax.random.normal(self._next(), (cin, cout), jnp.float32) * std)
        b = jax.random.normal(self._next(), (cout,), jnp.float32) * 0.01
        return w.astype(jnp.bfloat16), b


def make_rb(pg, cin, cout, stride=1):
    mid = cout // 4
    p = dict(stride=stride,
             bn1=pg.bn(cin),
             conv1=pg.conv1x1(cin, mid), bn2=pg.bn(mid),
             bn3=pg.bn(mid),
             conv3=pg.conv1x1(mid, cout),
             idn=pg.identity(cout))
    if stride == 1:
        p["conv2"] = pg.conv3x3_tap(mid, mid)
    else:
        p["conv2"] = pg.conv_k(3, mid, mid)
    if cin != cout or stride != 1:
        p["conv4"] = pg.conv1x1(cin, cout)
    return p


def make_mask_out(pg, c):
    return dict(bn1=pg.bn(c), conv1=pg.conv1x1(c, c),
                bn2=pg.bn(c), conv2=pg.conv1x1(c, c),
                idn=pg.identity(c))


def make_att1(pg, cin, cout):
    return dict(first=make_rb(pg, cin, cout),
                trunk=[make_rb(pg, cin, cout), make_rb(pg, cin, cout)],
                sm1=make_rb(pg, cin, cout), skip1=make_rb(pg, cin, cout),
                sm2=make_rb(pg, cin, cout), skip2=make_rb(pg, cin, cout),
                sm3=[make_rb(pg, cin, cout), make_rb(pg, cin, cout)],
                sm4=make_rb(pg, cin, cout), sm5=make_rb(pg, cin, cout),
                mask_out=make_mask_out(pg, cout), last=make_rb(pg, cin, cout))


def make_att2(pg, cin, cout):
    return dict(first=make_rb(pg, cin, cout),
                trunk=[make_rb(pg, cin, cout), make_rb(pg, cin, cout)],
                sm1=make_rb(pg, cin, cout), skip1=make_rb(pg, cin, cout),
                sm2=[make_rb(pg, cin, cout), make_rb(pg, cin, cout)],
                sm3=make_rb(pg, cin, cout),
                mask_out=make_mask_out(pg, cout), last=make_rb(pg, cin, cout))


def make_att3(pg, cin, cout):
    return dict(first=make_rb(pg, cin, cout),
                trunk=[make_rb(pg, cin, cout), make_rb(pg, cin, cout)],
                sm1=[make_rb(pg, cin, cout), make_rb(pg, cin, cout)],
                mask_out=make_mask_out(pg, cout), last=make_rb(pg, cin, cout))


def make_params():
    pg = ParamGen(42)
    P = dict(
        conv1_w=pg.conv_k(7, 3, 64), conv1_bn=pg.bn(64),
        rb1=make_rb(pg, 64, 256),
        att1=make_att1(pg, 256, 256),
        rb2=make_rb(pg, 256, 512, 2),
        att2=make_att2(pg, 512, 512),
        att2_2=make_att2(pg, 512, 512),
        rb3=make_rb(pg, 512, 1024, 2),
        att3=make_att3(pg, 1024, 1024),
        att3_2=make_att3(pg, 1024, 1024),
        att3_3=make_att3(pg, 1024, 1024),
        rb4=make_rb(pg, 1024, 2048, 2),
        rb5=make_rb(pg, 2048, 2048),
        rb6=make_rb(pg, 2048, 2048),
        mpool2_bn=pg.bn(2048))
    P["fc_w"], P["fc_b"] = pg.linear(2048, 1)
    return P


# ----------------------------------------------------------------------------
# Forward pass
# ----------------------------------------------------------------------------
def residual_block(p, x):
    s1, t1 = p["bn1"]
    out1 = bn_act(x, s1, t1, relu=True)                       # pre-activation
    s2, t2 = p["bn2"]
    h = conv1x1_bn(out1, p["conv1"], s2, t2, relu=True)       # conv1 + bn2 + relu
    s3, t3 = p["bn3"]
    if p["stride"] == 1:
        h = conv3x3s1_bn(h, p["conv2"], s3, t3, relu=True)    # conv2 + bn3 + relu
    else:
        h = conv_im2col_bn(h, p["conv2"], s3, t3,
                           ksize=3, stride=p["stride"], pad=1, relu=True)
    si, ti = p["idn"]
    if "conv4" in p:
        rin = out1 if p["stride"] == 1 else out1[:, ::p["stride"], ::p["stride"], :]
        residual = conv1x1_bn(rin, p["conv4"], si, ti, relu=False)
    else:
        residual = x
    return conv1x1_bn(h, p["conv3"], si, ti, residual=residual, relu=False)


def mask_output_branch(p, x):
    """BN-ReLU-Conv1x1-BN-ReLU-Conv1x1 (pre-sigmoid; sigmoid fused in combine kernel)."""
    s1, t1 = p["bn1"]
    y = bn_act(x, s1, t1, relu=True)
    s2, t2 = p["bn2"]
    y = conv1x1_bn(y, p["conv1"], s2, t2, relu=True)
    si, ti = p["idn"]
    return conv1x1_bn(y, p["conv2"], si, ti, relu=False)


def attention_stage1(p, x):
    x = residual_block(p["first"], x)
    out_trunk = residual_block(p["trunk"][1], residual_block(p["trunk"][0], x))
    m1 = maxpool3x3s2(x)
    sm1 = residual_block(p["sm1"], m1)
    skip1 = residual_block(p["skip1"], sm1)
    m2 = maxpool3x3s2(sm1)
    sm2 = residual_block(p["sm2"], m2)
    skip2 = residual_block(p["skip2"], sm2)
    m3 = maxpool3x3s2(sm2)
    sm3 = residual_block(p["sm3"][1], residual_block(p["sm3"][0], m3))
    out = ew_add(upsample_add(sm3, sm2), skip2)
    sm4 = residual_block(p["sm4"], out)
    out = ew_add(upsample_add(sm4, sm1), skip1)
    sm5 = residual_block(p["sm5"], out)
    interp1 = upsample_add(sm5, out_trunk)
    mask = mask_output_branch(p["mask_out"], interp1)
    out = mask_combine(mask, out_trunk)
    return residual_block(p["last"], out)


def attention_stage2(p, x):
    x = residual_block(p["first"], x)
    out_trunk = residual_block(p["trunk"][1], residual_block(p["trunk"][0], x))
    m1 = maxpool3x3s2(x)
    sm1 = residual_block(p["sm1"], m1)
    skip1 = residual_block(p["skip1"], sm1)
    m2 = maxpool3x3s2(sm1)
    sm2 = residual_block(p["sm2"][1], residual_block(p["sm2"][0], m2))
    out = ew_add(upsample_add(sm2, sm1), skip1)
    sm3 = residual_block(p["sm3"], out)
    interp1 = upsample_add(sm3, out_trunk)
    mask = mask_output_branch(p["mask_out"], interp1)
    out = mask_combine(mask, out_trunk)
    return residual_block(p["last"], out)


def attention_stage3(p, x):
    x = residual_block(p["first"], x)
    out_trunk = residual_block(p["trunk"][1], residual_block(p["trunk"][0], x))
    m1 = maxpool3x3s2(x)
    sm1 = residual_block(p["sm1"][1], residual_block(p["sm1"][0], m1))
    interp1 = upsample_add(sm1, out_trunk)
    mask = mask_output_branch(p["mask_out"], interp1)
    out = mask_combine(mask, out_trunk)
    return residual_block(p["last"], out)


def forward(P, x_nchw):
    x = jnp.transpose(x_nchw, (0, 2, 3, 1))                    # NCHW -> NHWC
    s, t = P["conv1_bn"]
    x = conv_im2col_bn(x, P["conv1_w"], s, t,
                       ksize=7, stride=2, pad=3, relu=True)    # conv1 + bn + relu
    x = maxpool3x3s2(x)                                        # mpool1
    x = residual_block(P["rb1"], x)
    x = attention_stage1(P["att1"], x)
    x = residual_block(P["rb2"], x)
    x = attention_stage2(P["att2"], x)
    x = attention_stage2(P["att2_2"], x)
    x = residual_block(P["rb3"], x)
    x = attention_stage3(P["att3"], x)
    x = attention_stage3(P["att3_2"], x)
    x = attention_stage3(P["att3_3"], x)
    x = residual_block(P["rb4"], x)
    x = residual_block(P["rb5"], x)
    x = residual_block(P["rb6"], x)
    s, t = P["mpool2_bn"]
    x = bn_act(x, s, t, relu=True)                             # mpool2: BN + ReLU
    feat = global_avgpool(x)                                   # AvgPool(7) -> (N, 2048)
    return fc_sigmoid(feat, P["fc_w"], P["fc_b"])              # (N, 1)


if __name__ == "__main__":
    # The architecture hard-requires 224x224 input (7x7 final map -> AvgPool(7) -> 2048-d fc),
    # so "small" here means batch=1 at the minimal consistent spatial size.
    key = jax.random.PRNGKey(0)
    x = jax.random.normal(key, (1, 3, 224, 224), jnp.float32)
    params = make_params()
    out = forward(params, x)
    out = jax.block_until_ready(out)
    assert out.shape == (1, 1), out.shape
    print("KERNEL_OK")
</pallas_src>

<mosaic_0001>
module attributes {stable_mosaic.version = 11 : i64} {
  func.func @_mm_fused_kernel(%arg0: i32, %arg1: i32, %arg2: i32, %arg3: memref<448x256xbf16, #tpu.memory_space<vmem>>, %arg4: memref<256x64xbf16, #tpu.memory_space<vmem>>, %arg5: memref<1x64xf32, #tpu.memory_space<vmem>>, %arg6: memref<1x64xf32, #tpu.memory_space<vmem>>, %arg7: memref<448x64xf32, #tpu.memory_space<vmem>>, %arg8: memref<448x64xf32, #tpu.memory_space<vmem>>) attributes {dimension_semantics = [#tpu.dimension_semantics<parallel>, #tpu.dimension_semantics<parallel>, #tpu.dimension_semantics<arbitrary>], iteration_bounds = array<i64: 28, 1, 1>, scalar_prefetch = 0 : i64, scratch_operands = 1 : i64, tpu.core_type = #tpu.core_type<tc>, window_params = [{transform_indices = @transform_0, window_bounds = array<i64: 448, 256>}, {transform_indices = @transform_1, window_bounds = array<i64: 256, 64>}, {transform_indices = @transform_2, window_bounds = array<i64: 1, 64>}, {transform_indices = @transform_3, window_bounds = array<i64: 1, 64>}, {transform_indices = @transform_4, window_bounds = array<i64: 448, 64>}]} {
    %c0_i32 = arith.constant 0 : i32
    %0 = arith.cmpi eq, %arg2, %c0_i32 : i32
    %1 = arith.extui %0 : i1 to i32
    %c0_i32_0 = arith.constant 0 : i32
    %2 = arith.cmpi ne, %1, %c0_i32_0 : i32
    scf.if %2 {
      %cst_10 = arith.constant 0.000000e+00 : f32
      %12 = vector.broadcast %cst_10 : f32 to vector<448x64xf32>
      %c0_11 = arith.constant 0 : index
      %c0_12 = arith.constant 0 : index
      %13 = vector.load %arg8[%c0_11, %c0_12] : memref<448x64xf32, #tpu.memory_space<vmem>>, vector<448x64xf32>
      tpu.vector_store %arg8[%c0_11, %c0_12], %12 {strides = array<i32>} : memref<448x64xf32, #tpu.memory_space<vmem>>, vector<448x64xf32>,
    } else {
    }
    %c0 = arith.constant 0 : index
    %c0_1 = arith.constant 0 : index
    %3 = vector.load %arg8[%c0, %c0_1] : memref<448x64xf32, #tpu.memory_space<vmem>>, vector<448x64xf32>
    %c0_2 = arith.constant 0 : index
    %c0_3 = arith.constant 0 : index
    %4 = vector.load %arg3[%c0_2, %c0_3] : memref<448x256xbf16, #tpu.memory_space<vmem>>, vector<448x256xbf16>
    %c0_4 = arith.constant 0 : index
    %c0_5 = arith.constant 0 : index
    %5 = vector.load %arg4[%c0_4, %c0_5] : memref<256x64xbf16, #tpu.memory_space<vmem>>, vector<256x64xbf16>
    %cst = arith.constant dense<0.000000e+00> : vector<448x64xf32>
    %6 = tpu.matmul %4, %5, %cst {dimension_numbers = #tpu.dot_dimension_numbers<[1], [0], [0], [1], [0, 0, 1, 1], [], []>} : vector<448x256xbf16>, vector<256x64xbf16>, vector<448x64xf32> -> vector<448x64xf32>
    %7 = arith.addf %3, %6 : vector<448x64xf32>
    %c0_6 = arith.constant 0 : index
    %c0_7 = arith.constant 0 : index
    %8 = vector.load %arg8[%c0_6, %c0_7] : memref<448x64xf32, #tpu.memory_space<vmem>>, vector<448x64xf32>
    tpu.vector_store %arg8[%c0_6, %c0_7], %7 {strides = array<i32>} : memref<448x64xf32, #tpu.memory_space<vmem>>, vector<448x64xf32>,
    %c0_i32_8 = arith.constant 0 : i32
    %9 = arith.cmpi eq, %arg2, %c0_i32_8 : i32
    %10 = arith.extui %9 : i1 to i32
    %c0_i32_9 = arith.constant 0 : i32
    %11 = arith.cmpi ne, %10, %c0_i32_9 : i32
    scf.if %11 {
      %c0_10 = arith.constant 0 : index
      %c0_11 = arith.constant 0 : index
      %12 = vector.load %arg8[%c0_10, %c0_11] : memref<448x64xf32, #tpu.memory_space<vmem>>, vector<448x64xf32>
      %c0_12 = arith.constant 0 : index
      %c0_13 = arith.constant 0 : index
      %13 = vector.load %arg5[%c0_12, %c0_13] : memref<1x64xf32, #tpu.memory_space<vmem>>, vector<1x64xf32>
      %14 = vector.broadcast %13 : vector<1x64xf32> to vector<448x64xf32>
      %15 = arith.mulf %12, %14 : vector<448x64xf32>
      %c0_14 = arith.constant 0 : index
      %c0_15 = arith.constant 0 : index
      %16 = vector.load %arg6[%c0_14, %c0_15] : memref<1x64xf32, #tpu.memory_space<vmem>>, vector<1x64xf32>
      %17 = vector.broadcast %16 : vector<1x64xf32> to vector<448x64xf32>
      %18 = arith.addf %15, %17 : vector<448x64xf32>
      %cst_16 = arith.constant 0.000000e+00 : f32
      %19 = vector.broadcast %cst_16 : f32 to vector<448x64xf32>
      %20 = arith.maximumf %18, %19 : vector<448x64xf32>
      %c0_17 = arith.constant 0 : index
      %c0_18 = arith.constant 0 : index
      %21 = vector.load %arg7[%c0_17, %c0_18] : memref<448x64xf32, #tpu.memory_space<vmem>>, vector<448x64xf32>
      tpu.vector_store %arg7[%c0_17, %c0_18], %20 {strides = array<i32>} : memref<448x64xf32, #tpu.memory_space<vmem>>, vector<448x64xf32>,
    } else {
    }
    return
  }
  func.func @transform_0(%arg0: i32, %arg1: i32, %arg2: i32) -> (i32, i32) {
    %c0_i32 = arith.constant 0 : i32
    return %arg0, %arg2 : i32, i32
  }
  func.func @transform_1(%arg0: i32, %arg1: i32, %arg2: i32) -> (i32, i32) {
    %c0_i32 = arith.constant 0 : i32
    return %arg2, %arg1 : i32, i32
  }
  func.func @transform_2(%arg0: i32, %arg1: i32, %arg2: i32) -> (i32, i32) {
    %c0_i32 = arith.constant 0 : i32
    %c0_i32_0 = arith.constant 0 : i32
    return %c0_i32, %arg1 : i32, i32
  }
  func.func @transform_3(%arg0: i32, %arg1: i32, %arg2: i32) -> (i32, i32) {
    %c0_i32 = arith.constant 0 : i32
    %c0_i32_0 = arith.constant 0 : i32
    return %c0_i32, %arg1 : i32, i32
  }
  func.func @transform_4(%arg0: i32, %arg1: i32, %arg2: i32) -> (i32, i32) {
    %c0_i32 = arith.constant 0 : i32
    return %arg0, %arg1 : i32, i32
  }
}

</mosaic_0001>

<bundles_post_ra>
// kernel: conv_im2col_bn.1
= control target key start
LH: loop header
LB: loop body
LE: loop exit
PB: predicated region body
PF: predicated region fallthrough
CT: control target
= control target key end

     0   :  { %s1982_s15 = smov 0   ;;  %s1984_s16 = smov 0   ;;  %s2506_s0 = inlined_call_operand.vmem [shape: bf16[12544,256], index: 0, kind: input, shape index: {}]   ;;  %s2507_s1 = inlined_call_operand.vmem [shape: bf16[256,64], index: 1, kind: input, shape index: {}]   ;;  %s2508_s2 = inlined_call_operand.vmem [shape: f32[1,64], index: 2, kind: input, shape index: {}]   ;;  %s2509_s3 = inlined_call_operand.vmem [shape: f32[1,64], index: 3, kind: input, shape index: {}]   ;;  %s2510_s4 = inlined_call_operand.vmem [shape: f32[12544,64], index: 4, kind: output, shape index: {}]  }
   0x1   :  { %s1986_s17 = smov 0  }
   0x2 LB: > { %s33_s18 = sadd.s32 1, %s1949_s16  ;;  %p1690_p0 = scmp.ge.s32.totalorder %s1953_s17, 1  ;;  %s1953_s17 = sphi %s1986_s17, %s14_s17   ;;  %s1949_s16 = sphi %s1984_s16, %s2512_s16   ;;  %s1945_s15 = sphi %s1982_s15, %s2511_s15  }
   0x3   : > { %p35_p1 = scmp.ge.s32.totalorder %s33_s18, 28  ;;  %p224_p2 = scmp.lt.s32.totalorder %s1953_s17, 29 }
   0x5   : > { %s2514_s18 = smov (%p35_p1, %s33_s18), 0  ;;  %p225_p3 = pnand %p1690_p0, %p224_p2 }
   0x6   : > { %v1829_v0 = vld [vmem:[%s2507_s1] sm:$0xff] (!%p225_p3)   ;;  %v1955_v1 = vmov (!%p225_p3), 0   ;;  %s272_s21 = smul.u32 (!%p225_p3), 56, %s1945_s15  ;;  %v1830_v2 = vld [vmem:[%s2507_s1 + $0x8] sm:$0xff] (!%p225_p3)   ;;  %v1831_v3 = vld [vmem:[%s2507_s1 + $0x10] sm:$0xff] (!%p225_p3)   ;;  %vm313_vm0 = vcmask (!%p225_p3), 523264  }
   0x7   : > { %228 = sbr.rel (%p225_p3) target bundleno = 407 (0x197), region = 36  ;;  %890 = vmatprep.subr.bf16.mxu0 (!%p225_p3), %v1955_v1  ;;  %1771 = vmatprep.subr.bf16.mxu1 (!%p225_p3), %v1955_v1  ;;  %v1832_v4 = vld [vmem:[%s2507_s1 + $0x18] sm:$0xff] (!%p225_p3)   ;;  %v1833_v5 = vld [vmem:[%s2507_s1 + $0x20] sm:$0xff] (!%p225_p3)   ;;  %v1834_v7 = vld [vmem:[%s2507_s1 + $0x28] sm:$0xff] (!%p225_p3)   ;;  %v1956_v15 = vmov (!%p225_p3), 0.0  }
   0x8   : > { %891 = vmatpush1.bf16.msra.mxu0 (!%p225_p3), %v1829_v0  ;;  %1787 = vmatpush1.bf16.msra.mxu1 (!%p225_p3), %v1829_v0  ;;  %p274_p4 = scmp.lt.s32.totalorder (!%p225_p3), %s272_s21, 1567  ;;  %v1835_v9 = vld [vmem:[%s2507_s1 + $0x30] sm:$0xff] (!%p225_p3)   ;;  %v1836_v10 = vld [vmem:[%s2507_s1 + $0x38] sm:$0xff] (!%p225_p3)   ;;  %v1837_v11 = vld [vmem:[%s2507_s1 + $0x40] sm:$0xff] (!%p225_p3)   ;;  %314 = vst.msk [vmem:[#allocation2] sm:$0xff] (!%p225_p3), %vm313_vm0, %v1956_v15 }
   0x9   : > { %892 = vmatprep.subr.bf16.mxu0 (!%p225_p3), %v1955_v1  ;;  %1772 = vmatprep.subr.bf16.mxu1 (!%p225_p3), %v1955_v1  ;;  %v1838_v12 = vld [vmem:[%s2507_s1 + $0x48] sm:$0xff] (!%p225_p3)   ;;  %v1839_v13 = vld [vmem:[%s2507_s1 + $0x50] sm:$0xff] (!%p225_p3)   ;;  %v1840_v14 = vld [vmem:[%s2507_s1 + $0x58] sm:$0xff] (!%p225_p3)   ;;  %315 = vst.msk [vmem:[#allocation2 + $0x8] sm:$0xff] (!%p225_p3), %vm313_vm0, %v1956_v15 }
   0xa   : > { %316 = vst.msk [vmem:[#allocation2 + $0x10] sm:$0xff] (!%p225_p3), %vm313_vm0, %v1956_v15  ;;  %317 = vst.msk [vmem:[#allocation2 + $0x18] sm:$0xff] (!%p225_p3), %vm313_vm0, %v1956_v15  ;;  %v1841_v16 = vld [vmem:[%s2507_s1 + $0x60] sm:$0xff] (!%p225_p3)   ;;  %v1842_v17 = vld [vmem:[%s2507_s1 + $0x68] sm:$0xff] (!%p225_p3)  }
   0xb   : > { %318 = vst.msk [vmem:[#allocation2 + $0x20] sm:$0xff] (!%p225_p3), %vm313_vm0, %v1956_v15  ;;  %319 = vst.msk [vmem:[#allocation2 + $0x28] sm:$0xff] (!%p225_p3), %vm313_vm0, %v1956_v15  ;;  %v1843_v18 = vld [vmem:[%s2507_s1 + $0x70] sm:$0xff] (!%p225_p3)   ;;  %v1844_v19 = vld [vmem:[%s2507_s1 + $0x78] sm:$0xff] (!%p225_p3)  }
   0xc   : > { %893 = vmatpush1.bf16.msra.mxu0 (!%p225_p3), %v1830_v2  ;;  %1788 = vmatpush1.bf16.msra.mxu1 (!%p225_p3), %v1830_v2  ;;  %320 = vst.msk [vmem:[#allocation2 + $0x30] sm:$0xff] (!%p225_p3), %vm313_vm0, %v1956_v15  ;;  %321 = vst.msk [vmem:[#allocation2 + $0x38] sm:$0xff] (!%p225_p3), %vm313_vm0, %v1956_v15 }
   0xd   : > { %894 = vmatprep.subr.bf16.mxu0 (!%p225_p3), %v1955_v1  ;;  %1773 = vmatprep.subr.bf16.mxu1 (!%p225_p3), %v1955_v1  ;;  %322 = vst.msk [vmem:[#allocation2 + $0x40] sm:$0xff] (!%p225_p3), %vm313_vm0, %v1956_v15  ;;  %323 = vst.msk [vmem:[#allocation2 + $0x48] sm:$0xff] (!%p225_p3), %vm313_vm0, %v1956_v15 }
   0xe   : > { %s2516_s21 = smov (!%p274_p4, %s272_s21), 1567  ;;  %324 = vst.msk [vmem:[#allocation2 + $0x50] sm:$0xff] %vm313_vm0, %v1956_v15  ;;  %325 = vst.msk [vmem:[#allocation2 + $0x58] sm:$0xff] %vm313_vm0, %v1956_v15 }
   0xf   : > { %s1770_s28 = sshll.u32 %s2516_s21, 3  ;;  %326 = vst.msk [vmem:[#allocation2 + $0x60] sm:$0xff] %vm313_vm0, %v1956_v15  ;;  %327 = vst.msk [vmem:[#allocation2 + $0x68] sm:$0xff] %vm313_vm0, %v1956_v15 }
  0x10   : > { %895 = vmatpush1.bf16.msra.mxu0 %v1831_v3  ;;  %1789 = vmatpush1.bf16.msra.mxu1 %v1831_v3  ;;  %s2031_s7 = scalar_lea.vmem %s2506_s0, %s1770_s28  ;;  %328 = vst.msk [vmem:[#allocation2 + $0x70] sm:$0xff] %vm313_vm0, %v1956_v15  ;;  %329 = vst.msk [vmem:[#allocation2 + $0x78] sm:$0xff] %vm313_vm0, %v1956_v15  ;;  %s2231_s15 = scalar_lea.vmem %s2510_s4, %s1770_s28 }
  0x11   : > { %896 = vmatprep.subr.bf16.mxu0 %v1955_v1  ;;  %1774 = vmatprep.subr.bf16.mxu1 %v1955_v1  ;;  %v1847_v6 = vld [vmem:[%s2031_s7 + $0x4] ss:$8 sps:$4 sm:$0xff]   ;;  %330 = vst.msk [vmem:[#allocation2 + $0x80] sm:$0xff] %vm313_vm0, %v1956_v15  ;;  %331 = vst.msk [vmem:[#allocation2 + $0x88] sm:$0xff] %vm313_vm0, %v1956_v15  ;;  %v1845_v20 = vld [vmem:[%s2031_s7] ss:$8 sps:$4 sm:$0xff]  }
  0x12   : > { %v1850_v8 = vld [vmem:[%s2031_s7 + $0xe4] ss:$8 sps:$4 sm:$0xff]   ;;  %922 = vmatprep.mubr.bf16.mxu0 %v1847_v6  ;;  %332 = vst.msk [vmem:[#allocation2 + $0x90] sm:$0xff] %vm313_vm0, %v1956_v15  ;;  %333 = vst.msk [vmem:[#allocation2 + $0x98] sm:$0xff] %vm313_vm0, %v1956_v15  ;;  %v1848_v21 = vld [vmem:[%s2031_s7 + $0xe0] ss:$8 sps:$4 sm:$0xff]  }
  0x13   : > { %1034 = vmatprep.mubr.bf16.mxu1 %v1850_v8  ;;  %334 = vst.msk [vmem:[#allocation2 + $0xa0] sm:$0xff] %vm313_vm0, %v1956_v15  ;;  %335 = vst.msk [vmem:[#allocation2 + $0xa8] sm:$0xff] %vm313_vm0, %v1956_v15  ;;  %v1851_v22 = vld [vmem:[%s2031_s7 + $0x14] ss:$8 sps:$4 sm:$0xff]   ;;  %v1855_v24 = vld [vmem:[%s2031_s7 + $0x10] ss:$8 sps:$4 sm:$0xff]  }
  0x14   : > { %897 = vmatpush1.bf16.msra.mxu0 %v1832_v4  ;;  %1790 = vmatpush1.bf16.msra.mxu1 %v1832_v4  ;;  %336 = vst.msk [vmem:[#allocation2 + $0xb0] sm:$0xff] %vm313_vm0, %v1956_v15  ;;  %337 = vst.msk [vmem:[#allocation2 + $0xb8] sm:$0xff] %vm313_vm0, %v1956_v15  ;;  %v1853_v23 = vld [vmem:[%s2031_s7 + $0xf4] ss:$8 sps:$4 sm:$0xff]   ;;  %v1856_v25 = vld [vmem:[%s2031_s7 + $0xf0] ss:$8 sps:$4 sm:$0xff]  }
  0x15   : > { %898 = vmatprep.subr.bf16.mxu0 %v1955_v1  ;;  %1775 = vmatprep.subr.bf16.mxu1 %v1955_v1  ;;  %338 = vst.msk [vmem:[#allocation2 + $0xc0] sm:$0xff] %vm313_vm0, %v1956_v15  ;;  %339 = vst.msk [vmem:[#allocation2 + $0xc8] sm:$0xff] %vm313_vm0, %v1956_v15  ;;  %v1857_v26 = vld [vmem:[%s2031_s7 + $0x24] ss:$8 sps:$4 sm:$0xff]   ;;  %v1861_v28 = vld [vmem:[%s2031_s7 + $0x20] ss:$8 sps:$4 sm:$0xff]  }
  0x16   : > { %340 = vst.msk [vmem:[#allocation2 + $0xd0] sm:$0xff] %vm313_vm0, %v1956_v15  ;;  %341 = vst.msk [vmem:[#allocation2 + $0xd8] sm:$0xff] %vm313_vm0, %v1956_v15  ;;  %v1859_v27 = vld [vmem:[%s2031_s7 + $0x104] ss:$8 sps:$4 sm:$0xff]   ;;  %v1862_v29 = vld [vmem:[%s2031_s7 + $0x100] ss:$8 sps:$4 sm:$0xff]  }
  0x17   : > { %342 = vst.msk [vmem:[#allocation2 + $0xe0] sm:$0xff] %vm313_vm0, %v1956_v15  ;;  %343 = vst.msk [vmem:[#allocation2 + $0xe8] sm:$0xff] %vm313_vm0, %v1956_v15  ;;  %v1863_v30 = vld [vmem:[%s2031_s7 + $0x34] ss:$8 sps:$4 sm:$0xff]   ;;  %v1867_v32 = vld [vmem:[%s2031_s7 + $0x30] ss:$8 sps:$4 sm:$0xff]  }
  0x18   : > { %899 = vmatpush1.bf16.msra.mxu0 %v1833_v5  ;;  %1791 = vmatpush1.bf16.msra.mxu1 %v1833_v5  ;;  %344 = vst.msk [vmem:[#allocation2 + $0xf0] sm:$0xff] %vm313_vm0, %v1956_v15  ;;  %345 = vst.msk [vmem:[#allocation2 + $0xf8] sm:$0xff] %vm313_vm0, %v1956_v15  ;;  %v1865_v31 = vld [vmem:[%s2031_s7 + $0x114] ss:$8 sps:$4 sm:$0xff]   ;;  %v1868_v33 = vld [vmem:[%s2031_s7 + $0x110] ss:$8 sps:$4 sm:$0xff]  }
  0x19   : > { %900 = vmatprep.subr.bf16.mxu0 %v1955_v1  ;;  %1776 = vmatprep.subr.bf16.mxu1 %v1955_v1  ;;  %346 = vst.msk [vmem:[#allocation2 + $0x100] sm:$0xff] %vm313_vm0, %v1956_v15  ;;  %347 = vst.msk [vmem:[#allocation2 + $0x108] sm:$0xff] %vm313_vm0, %v1956_v15  ;;  %v1869_v34 = vld [vmem:[%s2031_s7 + $0x44] ss:$8 sps:$4 sm:$0xff]   ;;  %v1873_v36 = vld [vmem:[%s2031_s7 + $0x40] ss:$8 sps:$4 sm:$0xff]  }
  0x1a   : > { %348 = vst.msk [vmem:[#allocation2 + $0x110] sm:$0xff] %vm313_vm0, %v1956_v15  ;;  %349 = vst.msk [vmem:[#allocation2 + $0x118] sm:$0xff] %vm313_vm0, %v1956_v15  ;;  %v1871_v35 = vld [vmem:[%s2031_s7 + $0x124] ss:$8 sps:$4 sm:$0xff]   ;;  %v1874_v37 = vld [vmem:[%s2031_s7 + $0x120] ss:$8 sps:$4 sm:$0xff]  }
  0x1b   : > { %350 = vst.msk [vmem:[#allocation2 + $0x120] sm:$0xff] %vm313_vm0, %v1956_v15  ;;  %351 = vst.msk [vmem:[#allocation2 + $0x128] sm:$0xff] %vm313_vm0, %v1956_v15  ;;  %v1875_v38 = vld [vmem:[%s2031_s7 + $0x54] ss:$8 sps:$4 sm:$0xff]   ;;  %v1879_v40 = vld [vmem:[%s2031_s7 + $0x50] ss:$8 sps:$4 sm:$0xff]  }
  0x1c   : > { %901 = vmatpush1.bf16.msra.mxu0 %v1834_v7  ;;  %1792 = vmatpush1.bf16.msra.mxu1 %v1834_v7  ;;  %352 = vst.msk [vmem:[#allocation2 + $0x130] sm:$0xff] %vm313_vm0, %v1956_v15  ;;  %353 = vst.msk [vmem:[#allocation2 + $0x138] sm:$0xff] %vm313_vm0, %v1956_v15  ;;  %v1877_v39 = vld [vmem:[%s2031_s7 + $0x134] ss:$8 sps:$4 sm:$0xff]   ;;  %v1880_v41 = vld [vmem:[%s2031_s7 + $0x130] ss:$8 sps:$4 sm:$0xff]  }
  0x1d   : > { %902 = vmatprep.subr.bf16.mxu0 %v1955_v1  ;;  %1777 = vmatprep.subr.bf16.mxu1 %v1955_v1  ;;  %354 = vst.msk [vmem:[#allocation2 + $0x140] sm:$0xff] %vm313_vm0, %v1956_v15  ;;  %355 = vst.msk [vmem:[#allocation2 + $0x148] sm:$0xff] %vm313_vm0, %v1956_v15  ;;  %v1881_v42 = vld [vmem:[%s2031_s7 + $0x64] ss:$8 sps:$4 sm:$0xff]   ;;  %v1885_v44 = vld [vmem:[%s2031_s7 + $0x60] ss:$8 sps:$4 sm:$0xff]  }
  0x1e   : > { %356 = vst.msk [vmem:[#allocation2 + $0x150] sm:$0xff] %vm313_vm0, %v1956_v15  ;;  %357 = vst.msk [vmem:[#allocation2 + $0x158] sm:$0xff] %vm313_vm0, %v1956_v15  ;;  %v1883_v43 = vld [vmem:[%s2031_s7 + $0x144] ss:$8 sps:$4 sm:$0xff]   ;;  %v1886_v45 = vld [vmem:[%s2031_s7 + $0x140] ss:$8 sps:$4 sm:$0xff]  }
  0x1f   : > { %358 = vst.msk [vmem:[#allocation2 + $0x160] sm:$0xff] %vm313_vm0, %v1956_v15  ;;  %359 = vst.msk [vmem:[#allocation2 + $0x168] sm:$0xff] %vm313_vm0, %v1956_v15  ;;  %v1887_v46 = vld [vmem:[%s2031_s7 + $0x74] ss:$8 sps:$4 sm:$0xff]   ;;  %v1891_v48 = vld [vmem:[%s2031_s7 + $0x70] ss:$8 sps:$4 sm:$0xff]  }
  0x20   : > { %903 = vmatpush1.bf16.msra.mxu0 %v1835_v9  ;;  %1793 = vmatpush1.bf16.msra.mxu1 %v1835_v9  ;;  %360 = vst.msk [vmem:[#allocation2 + $0x170] sm:$0xff] %vm313_vm0, %v1956_v15  ;;  %361 = vst.msk [vmem:[#allocation2 + $0x178] sm:$0xff] %vm313_vm0, %v1956_v15  ;;  %v1889_v47 = vld [vmem:[%s2031_s7 + $0x154] ss:$8 sps:$4 sm:$0xff]   ;;  %v1892_v49 = vld [vmem:[%s2031_s7 + $0x150] ss:$8 sps:$4 sm:$0xff]  }
  0x21   : > { %904 = vmatprep.subr.bf16.mxu0 %v1955_v1  ;;  %1778 = vmatprep.subr.bf16.mxu1 %v1955_v1  ;;  %362 = vst.msk [vmem:[#allocation2 + $0x180] sm:$0xff] %vm313_vm0, %v1956_v15  ;;  %363 = vst.msk [vmem:[#allocation2 + $0x188] sm:$0xff] %vm313_vm0, %v1956_v15  ;;  %v1893_v50 = vld [vmem:[%s2031_s7 + $0x84] ss:$8 sps:$4 sm:$0xff]   ;;  %v1897_v52 = vld [vmem:[%s2031_s7 + $0x80] ss:$8 sps:$4 sm:$0xff]  }
  0x22   : > { %364 = vst.msk [vmem:[#allocation2 + $0x190] sm:$0xff] %vm313_vm0, %v1956_v15  ;;  %365 = vst.msk [vmem:[#allocation2 + $0x198] sm:$0xff] %vm313_vm0, %v1956_v15  ;;  %v1895_v51 = vld [vmem:[%s2031_s7 + $0x164] ss:$8 sps:$4 sm:$0xff]   ;;  %v1898_v53 = vld [vmem:[%s2031_s7 + $0x160] ss:$8 sps:$4 sm:$0xff]  }
  0x23   : > { %366 = vst.msk [vmem:[#allocation2 + $0x1a0] sm:$0xff] %vm313_vm0, %v1956_v15  ;;  %367 = vst.msk [vmem:[#allocation2 + $0x1a8] sm:$0xff] %vm313_vm0, %v1956_v15  ;;  %v1899_v54 = vld [vmem:[%s2031_s7 + $0x94] ss:$8 sps:$4 sm:$0xff]   ;;  %v1903_v56 = vld [vmem:[%s2031_s7 + $0x90] ss:$8 sps:$4 sm:$0xff]  }
  0x24   : > { %905 = vmatpush1.bf16.msra.mxu0 %v1836_v10  ;;  %1794 = vmatpush1.bf16.msra.mxu1 %v1836_v10  ;;  %368 = vst.msk [vmem:[#allocation2 + $0x1b0] sm:$0xff] %vm313_vm0, %v1956_v15  ;;  %369 = vst.msk [vmem:[#allocation2 + $0x1b8] sm:$0xff] %vm313_vm0, %v1956_v15  ;;  %v1901_v55 = vld [vmem:[%s2031_s7 + $0x174] ss:$8 sps:$4 sm:$0xff]   ;;  %v1904_v57 = vld [vmem:[%s2031_s7 + $0x170] ss:$8 sps:$4 sm:$0xff]  }
  0x25   : > { %906 = vmatprep.subr.bf16.mxu0 %v1955_v1  ;;  %1779 = vmatprep.subr.bf16.mxu1 %v1955_v1  ;;  %v1905_v58 = vld [vmem:[%s2031_s7 + $0xa4] ss:$8 sps:$4 sm:$0xff]   ;;  %v1909_v60 = vld [vmem:[%s2031_s7 + $0xa0] ss:$8 sps:$4 sm:$0xff]   ;;  %v1911_v62 = vld [vmem:[%s2031_s7 + $0xb4] ss:$8 sps:$4 sm:$0xff]  }
  0x26   : > { %v1907_v59 = vld [vmem:[%s2031_s7 + $0x184] ss:$8 sps:$4 sm:$0xff]   ;;  %v1910_v61 = vld [vmem:[%s2031_s7 + $0x180] ss:$8 sps:$4 sm:$0xff]   ;;  %v1913_v63 = vld [vmem:[%s2031_s7 + $0x194] ss:$8 sps:$4 sm:$0xff]  }
  0x27   : > { %v1915_v0 = vld [vmem:[%s2031_s7 + $0xb0] ss:$8 sps:$4 sm:$0xff]   ;;  %v1917_v2 = vld [vmem:[%s2031_s7 + $0xc4] ss:$8 sps:$4 sm:$0xff]   ;;  %v1921_v4 = vld [vmem:[%s2031_s7 + $0xc0] ss:$8 sps:$4 sm:$0xff]  }
  0x28   : > { %907 = vmatpush1.bf16.msra.mxu0 %v1837_v11  ;;  %1795 = vmatpush1.bf16.msra.mxu1 %v1837_v11  ;;  %v1919_v3 = vld [vmem:[%s2031_s7 + $0x1a4] ss:$8 sps:$4 sm:$0xff]   ;;  %v1922_v5 = vld [vmem:[%s2031_s7 + $0x1a0] ss:$8 sps:$4 sm:$0xff]   ;;  %v1923_v6 = vld [vmem:[%s2031_s7 + $0xd4] ss:$8 sps:$4 sm:$0xff]  }
  0x29   : > { %908 = vmatprep.subr.bf16.mxu0 %v1955_v1  ;;  %1780 = vmatprep.subr.bf16.mxu1 %v1955_v1  ;;  %v1925_v7 = vld [vmem:[%s2031_s7 + $0x1b4] ss:$8 sps:$4 sm:$0xff]   ;;  %v1927_v8 = vld [vmem:[%s2031_s7 + $0xd0] ss:$8 sps:$4 sm:$0xff]   ;;  %v370_v10 = vld [vmem:[#allocation2] sm:$0xff] }
  0x2a   : > { %v1928_v9 = vld [vmem:[%s2031_s7 + $0x1b0] ss:$8 sps:$4 sm:$0xff]   ;;  %v398_v11 = vld [vmem:[#allocation2 + $0xe0] sm:$0xff]  ;;  %v399_v15 = vld [vmem:[#allocation2 + $0xe8] sm:$0xff] }
  0x2c   : > { %909 = vmatpush1.bf16.msra.mxu0 %v1838_v12  ;;  %1796 = vmatpush1.bf16.msra.mxu1 %v1838_v12 }
  0x2d   : > { %910 = vmatprep.subr.bf16.mxu0 %v1955_v1  ;;  %1781 = vmatprep.subr.bf16.mxu1 %v1955_v1 }
  0x30   : > { %911 = vmatpush1.bf16.msra.mxu0 %v1839_v13  ;;  %1797 = vmatpush1.bf16.msra.mxu1 %v1839_v13 }
  0x31   : > { %912 = vmatprep.subr.bf16.mxu0 %v1955_v1  ;;  %1782 = vmatprep.subr.bf16.mxu1 %v1955_v1 }
  0x34   : > { %913 = vmatpush1.bf16.msra.mxu0 %v1840_v14  ;;  %1798 = vmatpush1.bf16.msra.mxu1 %v1840_v14  ;;  %v371_v14 = vld [vmem:[#allocation2 + $0x8] sm:$0xff] }
  0x35   : > { %914 = vmatprep.subr.bf16.mxu0 %v1955_v1  ;;  %1783 = vmatprep.subr.bf16.mxu1 %v1955_v1 }
  0x38   : > { %915 = vmatpush1.bf16.msra.mxu0 %v1841_v16  ;;  %1799 = vmatpush1.bf16.msra.mxu1 %v1841_v16 }
  0x39   : > { %916 = vmatprep.subr.bf16.mxu0 %v1955_v1  ;;  %1784 = vmatprep.subr.bf16.mxu1 %v1955_v1 }
  0x3c   : > { %917 = vmatpush1.bf16.msra.mxu0 %v1842_v17  ;;  %1800 = vmatpush1.bf16.msra.mxu1 %v1842_v17 }
  0x3d   : > { %918 = vmatprep.subr.bf16.mxu0 %v1955_v1  ;;  %1785 = vmatprep.subr.bf16.mxu1 %v1955_v1 }
  0x40   : > { %919 = vmatpush1.bf16.msra.mxu0 %v1843_v18  ;;  %1801 = vmatpush1.bf16.msra.mxu1 %v1843_v18 }
  0x41   : > { %920 = vmatprep.subr.bf16.mxu0 %v1955_v1  ;;  %1786 = vmatprep.subr.bf16.mxu1 %v1955_v1  ;;  %v1916_v1 = vld [vmem:[%s2031_s7 + $0x190] ss:$8 sps:$4 sm:$0xff]  }
  0x44   : > { %921 = vmatpush1.bf16.msra.mxu0 %v1844_v19  ;;  %1802 = vmatpush1.bf16.msra.mxu1 %v1844_v19 }
  0x47   : > { %923 = vmatmul.mubr.bf16.vlgmr.msra.gmra.mrb[0].mxu0 %v1845_v20  ;;  %1035 = vmatmul.mubr.bf16.vlgmr.msra.gmra.mrb[0].mxu1 %v1848_v21 }
  0x48   : > { %930 = vmatprep.mubr.bf16.mxu0 %v1851_v22  ;;  %1042 = vmatprep.mubr.bf16.mxu1 %v1853_v23 }
  0x4f   : > { %931 = vmatmul.mubr.bf16.gmra.mrb[4].mxu0 %v1855_v24  ;;  %1043 = vmatmul.mubr.bf16.gmra.mrb[4].mxu1 %v1856_v25 }
  0x50   : > { %938 = vmatprep.mubr.bf16.mxu0 %v1857_v26  ;;  %1050 = vmatprep.mubr.bf16.mxu1 %v1859_v27  ;;  %v372_v26 = vld [vmem:[#allocation2 + $0x10] sm:$0xff] }
  0x51   : > { %v400_v27 = vld [vmem:[#allocation2 + $0xf0] sm:$0xff] }
  0x57   : > { %939 = vmatmul.mubr.bf16.gmra.mrb[8].mxu0 %v1861_v28  ;;  %1051 = vmatmul.mubr.bf16.gmra.mrb[8].mxu1 %v1862_v29  ;;  %v2209_v28 = vld [vmem:[%s2508_s2] ss:$0 sm:$0xff] }
  0x58   : > { %946 = vmatprep.mubr.bf16.mxu0 %v1863_v30  ;;  %1058 = vmatprep.mubr.bf16.mxu1 %v1865_v31  ;;  %v373_v31 = vld [vmem:[#allocation2 + $0x18] sm:$0xff] }
  0x5f   : > { %947 = vmatmul.mubr.bf16.gmra.mrb[12].mxu0 %v1867_v32  ;;  %1059 = vmatmul.mubr.bf16.gmra.mrb[12].mxu1 %v1868_v33  ;;  %v401_v32 = vld [vmem:[#allocation2 + $0xf8] sm:$0xff] }
  0x60   : > { %954 = vmatprep.mubr.bf16.mxu0 %v1869_v34  ;;  %1066 = vmatprep.mubr.bf16.mxu1 %v1871_v35 }
  0x67   : > { %955 = vmatmul.mubr.bf16.gmra.mrb[16].mxu0 %v1873_v36  ;;  %1067 = vmatmul.mubr.bf16.gmra.mrb[16].mxu1 %v1874_v37 }
  0x68   : > { %962 = vmatprep.mubr.bf16.mxu0 %v1875_v38  ;;  %1074 = vmatprep.mubr.bf16.mxu1 %v1877_v39  ;;  %v2214_v38 = vld [vmem:[%s2509_s3] ss:$0 sm:$0xff] }
  0x6f   : > { %963 = vmatmul.mubr.bf16.gmra.mrb[20].mxu0 %v1879_v40  ;;  %1075 = vmatmul.mubr.bf16.gmra.mrb[20].mxu1 %v1880_v41 }
  0x70   : > { %970 = vmatprep.mubr.bf16.mxu0 %v1881_v42  ;;  %1082 = vmatprep.mubr.bf16.mxu1 %v1883_v43 }
  0x77   : > { %971 = vmatmul.mubr.bf16.gmra.mrb[24].mxu0 %v1885_v44  ;;  %1083 = vmatmul.mubr.bf16.gmra.mrb[24].mxu1 %v1886_v45 }
  0x78   : > { %978 = vmatprep.mubr.bf16.mxu0 %v1887_v46  ;;  %1090 = vmatprep.mubr.bf16.mxu1 %v1889_v47 }
  0x7f   : > { %979 = vmatmul.mubr.bf16.gmra.mrb[28].mxu0 %v1891_v48  ;;  %1091 = vmatmul.mubr.bf16.gmra.mrb[28].mxu1 %v1892_v49 }
  0x80   : > { %986 = vmatprep.mubr.bf16.mxu0 %v1893_v50  ;;  %1098 = vmatprep.mubr.bf16.mxu1 %v1895_v51 }
  0x87   : > { %987 = vmatmul.mubr.bf16.gmra.mrb[32].mxu0 %v1897_v52  ;;  %1099 = vmatmul.mubr.bf16.gmra.mrb[32].mxu1 %v1898_v53 }
  0x88   : > { %994 = vmatprep.mubr.bf16.mxu0 %v1899_v54  ;;  %1106 = vmatprep.mubr.bf16.mxu1 %v1901_v55  ;;  %v374_v54 = vld [vmem:[#allocation2 + $0x20] sm:$0xff] }
  0x89   : > { %v402_v55 = vld [vmem:[#allocation2 + $0x100] sm:$0xff] }
  0x8f   : > { %995 = vmatmul.mubr.bf16.gmra.mrb[36].mxu0 %v1903_v56  ;;  %1107 = vmatmul.mubr.bf16.gmra.mrb[36].mxu1 %v1904_v57 }
  0x90   : > { %1002 = vmatprep.mubr.bf16.mxu0 %v1905_v58  ;;  %1114 = vmatprep.mubr.bf16.mxu1 %v1907_v59 }
  0x97   : > { %1003 = vmatmul.mubr.bf16.gmra.mrb[40].mxu0 %v1909_v60  ;;  %1115 = vmatmul.mubr.bf16.gmra.mrb[40].mxu1 %v1910_v61 }
  0x98   : > { %1010 = vmatprep.mubr.bf16.mxu0 %v1911_v62  ;;  %1122 = vmatprep.mubr.bf16.mxu1 %v1913_v63  ;;  %v375_v62 = vld [vmem:[#allocation2 + $0x28] sm:$0xff] }
  0x99   : > { %v403_v63 = vld [vmem:[#allocation2 + $0x108] sm:$0xff] }
  0x9f   : > { %1011 = vmatmul.mubr.bf16.gmra.mrb[44].mxu0 %v1915_v0  ;;  %1123 = vmatmul.mubr.bf16.gmra.mrb[44].mxu1 %v1916_v1 }
  0xa0   : > { %1018 = vmatprep.mubr.bf16.mxu0 %v1917_v2  ;;  %1130 = vmatprep.mubr.bf16.mxu1 %v1919_v3 }
  0xa7   : > { %1019 = vmatmul.mubr.bf16.gmra.mrb[48].mxu0 %v1921_v4  ;;  %1131 = vmatmul.mubr.bf16.gmra.mrb[48].mxu1 %v1922_v5 }
  0xa8   : > { %1026 = vmatprep.mubr.bf16.mxu0 %v1923_v6  ;;  %1138 = vmatprep.mubr.bf16.mxu1 %v1925_v7 }
  0xaf   : > { %1027 = vmatmul.mubr.bf16.gmra.mrb[52].mxu0 %v1927_v8  ;;  %1139 = vmatmul.mubr.bf16.gmra.mrb[52].mxu1 %v1928_v9 }
 0x11a   : > { %v924_v12 = vpop.f32.mrb[0].mxu0  ;;  %v1036_v13 = vpop.f32.mrb[0].mxu1 }
 0x11b   : > { %v1147_v16 = vadd.f32 %v924_v12, %v370_v10  ;;  %v1175_v17 = vadd.f32 %v1036_v13, %v398_v11  ;;  %v926_v18 = vpop.f32.mrb[1].mxu0  ;;  %v1038_v19 = vpop.f32.mrb[1].mxu1 }
 0x11c   : > { %v927_v20 = vpop.f32.mrb[2].mxu0  ;;  %v1039_v21 = vpop.f32.mrb[2].mxu1 }
 0x11d   : > { %1204 = vst.msk [vmem:[#allocation2] sm:$0xff] %vm313_vm0, %v1147_v16  ;;  %1232 = vst.msk [vmem:[#allocation2 + $0xe0] sm:$0xff] %vm313_vm0, %v1175_v17  ;;  %v1148_v22 = vadd.f32 %v927_v20, %v371_v14  ;;  %v1176_v23 = vadd.f32 %v1039_v21, %v399_v15  ;;  %v929_v24 = vpop.f32.mrb[3].mxu0  ;;  %v1041_v25 = vpop.f32.mrb[3].mxu1 }
 0x11f   : > { %1205 = vst.msk [vmem:[#allocation2 + $0x8] sm:$0xff] %vm313_vm0, %v1148_v22  ;;  %1233 = vst.msk [vmem:[#allocation2 + $0xe8] sm:$0xff] %vm313_vm0, %v1176_v23  ;;  %v376_v22 = vld [vmem:[#allocation2 + $0x30] sm:$0xff] }
 0x120   : > { %v404_v23 = vld [vmem:[#allocation2 + $0x110] sm:$0xff] }
 0x122   : > { %v932_v29 = vpop.f32.mrb[4].mxu0  ;;  %v1044_v30 = vpop.f32.mrb[4].mxu1 }
 0x123   : > { %v1149_v33 = vadd.f32 %v932_v29, %v372_v26  ;;  %v1177_v34 = vadd.f32 %v1044_v30, %v400_v27  ;;  %v934_v35 = vpop.f32.mrb[5].mxu0  ;;  %v1046_v36 = vpop.f32.mrb[5].mxu1 }
 0x124   : > { %v1263_v37 = vld [vmem:[#allocation2] sm:$0xff]  ;;  %v935_v40 = vpop.f32.mrb[6].mxu0  ;;  %v1047_v41 = vpop.f32.mrb[6].mxu1 }
 0x125   : > { %v1291_v39 = vld [vmem:[#allocation2 + $0xe0] sm:$0xff]  ;;  %v1326_v42 = vmul.f32 %v2209_v28, %v1263_v37  ;;  %1206 = vst.msk [vmem:[#allocation2 + $0x10] sm:$0xff] %vm313_vm0, %v1149_v33  ;;  %1234 = vst.msk [vmem:[#allocation2 + $0xf0] sm:$0xff] %vm313_vm0, %v1177_v34  ;;  %v1150_v44 = vadd.f32 %v935_v40, %v373_v31  ;;  %v1178_v45 = vadd.f32 %v1047_v41, %v401_v32  ;;  %v937_v46 = vpop.f32.mrb[7].mxu0  ;;  %v1049_v47 = vpop.f32.mrb[7].mxu1  ;;  %v377_v31 = vld [vmem:[#allocation2 + $0x38] sm:$0xff] }
 0x126   : > { %v1354_v43 = vmul.f32 %v2209_v28, %v1291_v39  ;;  %v1264_v48 = vld [vmem:[#allocation2 + $0x8] sm:$0xff]  ;;  %v405_v32 = vld [vmem:[#allocation2 + $0x118] sm:$0xff] }
 0x127   : > { %v1292_v49 = vld [vmem:[#allocation2 + $0xe8] sm:$0xff]  ;;  %v1389_v50 = vadd.f32 %v2214_v38, %v1326_v42  ;;  %v1327_v52 = vmul.f32 %v2209_v28, %v1264_v48  ;;  %1207 = vst.msk [vmem:[#allocation2 + $0x18] sm:$0xff] %vm313_vm0, %v1150_v44  ;;  %1235 = vst.msk [vmem:[#allocation2 + $0xf8] sm:$0xff] %vm313_vm0, %v1178_v45 }
 0x128   : > { %v1417_v51 = vadd.f32 %v2214_v38, %v1354_v43  ;;  %v1355_v53 = vmul.f32 %v2209_v28, %v1292_v49 }
 0x129   : > { %v1445_v56 = vmax.f32 %v1389_v50, 0.0  ;;  %v1390_v58 = vadd.f32 %v2214_v38, %v1327_v52 }
 0x12a   : > { %v1473_v57 = vmax.f32 %v1417_v51, 0.0  ;;  %v1418_v59 = vadd.f32 %v2214_v38, %v1355_v53  ;;  %v940_v60 = vpop.f32.mrb[8].mxu0  ;;  %v1052_v61 = vpop.f32.mrb[8].mxu1 }
 0x12b   : > { %1501 = vst.msk [vmem:[%s2231_s15] sm:$0xff] %vm313_vm0, %v1445_v56  ;;  %v1446_v0 = vmax.f32 %v1390_v58, 0.0  ;;  %v1151_v2 = vadd.f32 %v940_v60, %v374_v54  ;;  %v1179_v3 = vadd.f32 %v1052_v61, %v402_v55  ;;  %v942_v4 = vpop.f32.mrb[9].mxu0  ;;  %v1054_v5 = vpop.f32.mrb[9].mxu1  ;;  %v378_v56 = vld [vmem:[#allocation2 + $0x40] sm:$0xff] }
 0x12c   : > { %1529 = vst.msk [vmem:[%s2231_s15 + $0xe0] sm:$0xff] %vm313_vm0, %v1473_v57  ;;  %v1474_v1 = vmax.f32 %v1418_v59, 0.0  ;;  %v1265_v6 = vld [vmem:[#allocation2 + $0x10] sm:$0xff]  ;;  %v943_v8 = vpop.f32.mrb[10].mxu0  ;;  %v1055_v9 = vpop.f32.mrb[10].mxu1  ;;  %v406_v57 = vld [vmem:[#allocation2 + $0x120] sm:$0xff] }
 0x12d   : > { %v1293_v7 = vld [vmem:[#allocation2 + $0xf0] sm:$0xff]  ;;  %1502 = vst.msk [vmem:[%s2231_s15 + $0x8] sm:$0xff] %vm313_vm0, %v1446_v0  ;;  %v1328_v10 = vmul.f32 %v2209_v28, %v1265_v6  ;;  %1208 = vst.msk [vmem:[#allocation2 + $0x20] sm:$0xff] %vm313_vm0, %v1151_v2  ;;  %v1152_v12 = vadd.f32 %v943_v8, %v375_v62  ;;  %v1180_v13 = vadd.f32 %v1055_v9, %v403_v63  ;;  %v945_v14 = vpop.f32.mrb[11].mxu0  ;;  %v1057_v15 = vpop.f32.mrb[11].mxu1  ;;  %v379_v0 = vld [vmem:[#allocation2 + $0x48] sm:$0xff] }
 0x12e   : > { %1530 = vst.msk [vmem:[%s2231_s15 + $0xe8] sm:$0xff] %vm313_vm0, %v1474_v1  ;;  %v1356_v11 = vmul.f32 %v2209_v28, %v1293_v7  ;;  %1236 = vst.msk [vmem:[#allocation2 + $0x100] sm:$0xff] %vm313_vm0, %v1179_v3  ;;  %v1266_v16 = vld [vmem:[#allocation2 + $0x18] sm:$0xff]  ;;  %v407_v1 = vld [vmem:[#allocation2 + $0x128] sm:$0xff] }
 0x12f   : > { %v1294_v17 = vld [vmem:[#allocation2 + $0xf8] sm:$0xff]  ;;  %v1391_v18 = vadd.f32 %v2214_v38, %v1328_v10  ;;  %v1329_v20 = vmul.f32 %v2209_v28, %v1266_v16  ;;  %1209 = vst.msk [vmem:[#allocation2 + $0x28] sm:$0xff] %vm313_vm0, %v1152_v12  ;;  %1237 = vst.msk [vmem:[#allocation2 + $0x108] sm:$0xff] %vm313_vm0, %v1180_v13 }
 0x130   : > { %v1419_v19 = vadd.f32 %v2214_v38, %v1356_v11  ;;  %v1357_v21 = vmul.f32 %v2209_v28, %v1294_v17 }
 0x131   : > { %v1447_v24 = vmax.f32 %v1391_v18, 0.0  ;;  %v1392_v26 = vadd.f32 %v2214_v38, %v1329_v20 }
 0x132   : > { %v1475_v25 = vmax.f32 %v1419_v19, 0.0  ;;  %v1420_v27 = vadd.f32 %v2214_v38, %v1357_v21  ;;  %v948_v29 = vpop.f32.mrb[12].mxu0  ;;  %v1060_v30 = vpop.f32.mrb[12].mxu1 }
 0x133   : > { %1503 = vst.msk [vmem:[%s2231_s15 + $0x10] sm:$0xff] %vm313_vm0, %v1447_v24  ;;  %v1448_v33 = vmax.f32 %v1392_v26, 0.0  ;;  %v1153_v35 = vadd.f32 %v948_v29, %v376_v22  ;;  %v1181_v36 = vadd.f32 %v1060_v30, %v404_v23  ;;  %v950_v37 = vpop.f32.mrb[13].mxu0  ;;  %v1062_v39 = vpop.f32.mrb[13].mxu1  ;;  %v380_v24 = vld [vmem:[#allocation2 + $0x50] sm:$0xff] }
 0x134   : > { %1531 = vst.msk [vmem:[%s2231_s15 + $0xf0] sm:$0xff] %vm313_vm0, %v1475_v25  ;;  %v1476_v34 = vmax.f32 %v1420_v27, 0.0  ;;  %v1267_v40 = vld [vmem:[#allocation2 + $0x20] sm:$0xff]  ;;  %v951_v42 = vpop.f32.mrb[14].mxu0  ;;  %v1063_v43 = vpop.f32.mrb[14].mxu1  ;;  %v408_v25 = vld [vmem:[#allocation2 + $0x130] sm:$0xff] }
 0x135   : > { %v1295_v41 = vld [vmem:[#allocation2 + $0x100] sm:$0xff]  ;;  %1504 = vst.msk [vmem:[%s2231_s15 + $0x18] sm:$0xff] %vm313_vm0, %v1448_v33  ;;  %v1330_v44 = vmul.f32 %v2209_v28, %v1267_v40  ;;  %1210 = vst.msk [vmem:[#allocation2 + $0x30] sm:$0xff] %vm313_vm0, %v1153_v35  ;;  %v1154_v46 = vadd.f32 %v951_v42, %v377_v31  ;;  %v1182_v47 = vadd.f32 %v1063_v43, %v405_v32  ;;  %v953_v48 = vpop.f32.mrb[15].mxu0  ;;  %v1065_v49 = vpop.f32.mrb[15].mxu1  ;;  %v381_v33 = vld [vmem:[#allocation2 + $0x58] sm:$0xff] }
 0x136   : > { %1532 = vst.msk [vmem:[%s2231_s15 + $0xf8] sm:$0xff] %vm313_vm0, %v1476_v34  ;;  %v1358_v45 = vmul.f32 %v2209_v28, %v1295_v41  ;;  %1238 = vst.msk [vmem:[#allocation2 + $0x110] sm:$0xff] %vm313_vm0, %v1181_v36  ;;  %v1268_v50 = vld [vmem:[#allocation2 + $0x28] sm:$0xff]  ;;  %v409_v34 = vld [vmem:[#allocation2 + $0x138] sm:$0xff] }
 0x137   : > { %v1296_v51 = vld [vmem:[#allocation2 + $0x108] sm:$0xff]  ;;  %v1393_v52 = vadd.f32 %v2214_v38, %v1330_v44  ;;  %v1331_v54 = vmul.f32 %v2209_v28, %v1268_v50  ;;  %1211 = vst.msk [vmem:[#allocation2 + $0x38] sm:$0xff] %vm313_vm0, %v1154_v46  ;;  %1239 = vst.msk [vmem:[#allocation2 + $0x118] sm:$0xff] %vm313_vm0, %v1182_v47 }
 0x138   : > { %v1421_v53 = vadd.f32 %v2214_v38, %v1358_v45  ;;  %v1359_v55 = vmul.f32 %v2209_v28, %v1296_v51 }
 0x139   : > { %v1449_v58 = vmax.f32 %v1393_v52, 0.0  ;;  %v1394_v60 = vadd.f32 %v2214_v38, %v1331_v54 }
 0x13a   : > { %v1477_v59 = vmax.f32 %v1421_v53, 0.0  ;;  %v1422_v61 = vadd.f32 %v2214_v38, %v1359_v55  ;;  %v956_v62 = vpop.f32.mrb[16].mxu0  ;;  %v1068_v63 = vpop.f32.mrb[16].mxu1 }
 0x13b   : > { %1505 = vst.msk [vmem:[%s2231_s15 + $0x20] sm:$0xff] %vm313_vm0, %v1449_v58  ;;  %v1450_v2 = vmax.f32 %v1394_v60, 0.0  ;;  %v1155_v4 = vadd.f32 %v956_v62, %v378_v56  ;;  %v1183_v5 = vadd.f32 %v1068_v63, %v406_v57  ;;  %v958_v6 = vpop.f32.mrb[17].mxu0  ;;  %v1070_v7 = vpop.f32.mrb[17].mxu1  ;;  %v382_v58 = vld [vmem:[#allocation2 + $0x60] sm:$0xff] }
 0x13c   : > { %1533 = vst.msk [vmem:[%s2231_s15 + $0x100] sm:$0xff] %vm313_vm0, %v1477_v59  ;;  %v1478_v3 = vmax.f32 %v1422_v61, 0.0  ;;  %v1269_v8 = vld [vmem:[#allocation2 + $0x30] sm:$0xff]  ;;  %v959_v10 = vpop.f32.mrb[18].mxu0  ;;  %v1071_v11 = vpop.f32.mrb[18].mxu1  ;;  %v410_v59 = vld [vmem:[#allocation2 + $0x140] sm:$0xff] }
 0x13d   : > { %v1297_v9 = vld [vmem:[#allocation2 + $0x110] sm:$0xff]  ;;  %1506 = vst.msk [vmem:[%s2231_s15 + $0x28] sm:$0xff] %vm313_vm0, %v1450_v2  ;;  %v1332_v12 = vmul.f32 %v2209_v28, %v1269_v8  ;;  %1212 = vst.msk [vmem:[#allocation2 + $0x40] sm:$0xff] %vm313_vm0, %v1155_v4  ;;  %v1156_v14 = vadd.f32 %v959_v10, %v379_v0  ;;  %v1184_v15 = vadd.f32 %v1071_v11, %v407_v1  ;;  %v961_v16 = vpop.f32.mrb[19].mxu0  ;;  %v1073_v17 = vpop.f32.mrb[19].mxu1  ;;  %v383_v2 = vld [vmem:[#allocation2 + $0x68] sm:$0xff] }
 0x13e   : > { %1534 = vst.msk [vmem:[%s2231_s15 + $0x108] sm:$0xff] %vm313_vm0, %v1478_v3  ;;  %v1360_v13 = vmul.f32 %v2209_v28, %v1297_v9  ;;  %1240 = vst.msk [vmem:[#allocation2 + $0x120] sm:$0xff] %vm313_vm0, %v1183_v5  ;;  %v1270_v18 = vld [vmem:[#allocation2 + $0x38] sm:$0xff]  ;;  %v411_v3 = vld [vmem:[#allocation2 + $0x148] sm:$0xff] }
 0x13f   : > { %v1298_v19 = vld [vmem:[#allocation2 + $0x118] sm:$0xff]  ;;  %v1395_v20 = vadd.f32 %v2214_v38, %v1332_v12  ;;  %v1333_v22 = vmul.f32 %v2209_v28, %v1270_v18  ;;  %1213 = vst.msk [vmem:[#allocation2 + $0x48] sm:$0xff] %vm313_vm0, %v1156_v14  ;;  %1241 = vst.msk [vmem:[#allocation2 + $0x128] sm:$0xff] %vm313_vm0, %v1184_v15 }
 0x140   : > { %v1423_v21 = vadd.f32 %v2214_v38, %v1360_v13  ;;  %v1361_v23 = vmul.f32 %v2209_v28, %v1298_v19 }
 0x141   : > { %v1451_v26 = vmax.f32 %v1395_v20, 0.0  ;;  %v1396_v29 = vadd.f32 %v2214_v38, %v1333_v22 }
 0x142   : > { %v1479_v27 = vmax.f32 %v1423_v21, 0.0  ;;  %v1424_v30 = vadd.f32 %v2214_v38, %v1361_v23  ;;  %v964_v31 = vpop.f32.mrb[20].mxu0  ;;  %v1076_v32 = vpop.f32.mrb[20].mxu1 }
 0x143   : > { %1507 = vst.msk [vmem:[%s2231_s15 + $0x30] sm:$0xff] %vm313_vm0, %v1451_v26  ;;  %v1452_v35 = vmax.f32 %v1396_v29, 0.0  ;;  %v1157_v37 = vadd.f32 %v964_v31, %v380_v24  ;;  %v1185_v39 = vadd.f32 %v1076_v32, %v408_v25  ;;  %v966_v40 = vpop.f32.mrb[21].mxu0  ;;  %v1078_v41 = vpop.f32.mrb[21].mxu1  ;;  %v384_v26 = vld [vmem:[#allocation2 + $0x70] sm:$0xff] }
 0x144   : > { %1535 = vst.msk [vmem:[%s2231_s15 + $0x110] sm:$0xff] %vm313_vm0, %v1479_v27  ;;  %v1480_v36 = vmax.f32 %v1424_v30, 0.0  ;;  %v1271_v42 = vld [vmem:[#allocation2 + $0x40] sm:$0xff]  ;;  %v967_v44 = vpop.f32.mrb[22].mxu0  ;;  %v1079_v45 = vpop.f32.mrb[22].mxu1  ;;  %v412_v27 = vld [vmem:[#allocation2 + $0x150] sm:$0xff] }
 0x145   : > { %v1299_v43 = vld [vmem:[#allocation2 + $0x120] sm:$0xff]  ;;  %1508 = vst.msk [vmem:[%s2231_s15 + $0x38] sm:$0xff] %vm313_vm0, %v1452_v35  ;;  %v1334_v46 = vmul.f32 %v2209_v28, %v1271_v42  ;;  %1214 = vst.msk [vmem:[#allocation2 + $0x50] sm:$0xff] %vm313_vm0, %v1157_v37  ;;  %v1158_v48 = vadd.f32 %v967_v44, %v381_v33  ;;  %v1186_v49 = vadd.f32 %v1079_v45, %v409_v34  ;;  %v969_v50 = vpop.f32.mrb[23].mxu0  ;;  %v1081_v51 = vpop.f32.mrb[23].mxu1  ;;  %v385_v35 = vld [vmem:[#allocation2 + $0x78] sm:$0xff] }
 0x146   : > { %1536 = vst.msk [vmem:[%s2231_s15 + $0x118] sm:$0xff] %vm313_vm0, %v1480_v36  ;;  %v1362_v47 = vmul.f32 %v2209_v28, %v1299_v43  ;;  %1242 = vst.msk [vmem:[#allocation2 + $0x130] sm:$0xff] %vm313_vm0, %v1185_v39  ;;  %v1272_v52 = vld [vmem:[#allocation2 + $0x48] sm:$0xff]  ;;  %v413_v36 = vld [vmem:[#allocation2 + $0x158] sm:$0xff] }
 0x147   : > { %v1300_v53 = vld [vmem:[#allocation2 + $0x128] sm:$0xff]  ;;  %v1397_v54 = vadd.f32 %v2214_v38, %v1334_v46  ;;  %v1335_v56 = vmul.f32 %v2209_v28, %v1272_v52  ;;  %1215 = vst.msk [vmem:[#allocation2 + $0x58] sm:$0xff] %vm313_vm0, %v1158_v48  ;;  %1243 = vst.msk [vmem:[#allocation2 + $0x138] sm:$0xff] %vm313_vm0, %v1186_v49 }
 0x148   : > { %v1425_v55 = vadd.f32 %v2214_v38, %v1362_v47  ;;  %v1363_v57 = vmul.f32 %v2209_v28, %v1300_v53 }
 0x149   : > { %v1453_v60 = vmax.f32 %v1397_v54, 0.0  ;;  %v1398_v62 = vadd.f32 %v2214_v38, %v1335_v56 }
 0x14a   : > { %v1481_v61 = vmax.f32 %v1425_v55, 0.0  ;;  %v1426_v63 = vadd.f32 %v2214_v38, %v1363_v57  ;;  %v972_v0 = vpop.f32.mrb[24].mxu0  ;;  %v1084_v1 = vpop.f32.mrb[24].mxu1 }
 0x14b   : > { %1509 = vst.msk [vmem:[%s2231_s15 + $0x40] sm:$0xff] %vm313_vm0, %v1453_v60  ;;  %v1454_v4 = vmax.f32 %v1398_v62, 0.0  ;;  %v1159_v6 = vadd.f32 %v972_v0, %v382_v58  ;;  %v1187_v7 = vadd.f32 %v1084_v1, %v410_v59  ;;  %v974_v8 = vpop.f32.mrb[25].mxu0  ;;  %v1086_v9 = vpop.f32.mrb[25].mxu1  ;;  %v386_v60 = vld [vmem:[#allocation2 + $0x80] sm:$0xff] }
 0x14c   : > { %1537 = vst.msk [vmem:[%s2231_s15 + $0x120] sm:$0xff] %vm313_vm0, %v1481_v61  ;;  %v1482_v5 = vmax.f32 %v1426_v63, 0.0  ;;  %v1273_v10 = vld [vmem:[#allocation2 + $0x50] sm:$0xff]  ;;  %v975_v12 = vpop.f32.mrb[26].mxu0  ;;  %v1087_v13 = vpop.f32.mrb[26].mxu1  ;;  %v414_v61 = vld [vmem:[#allocation2 + $0x160] sm:$0xff] }
 0x14d   : > { %v1301_v11 = vld [vmem:[#allocation2 + $0x130] sm:$0xff]  ;;  %1510 = vst.msk [vmem:[%s2231_s15 + $0x48] sm:$0xff] %vm313_vm0, %v1454_v4  ;;  %v1336_v14 = vmul.f32 %v2209_v28, %v1273_v10  ;;  %1216 = vst.msk [vmem:[#allocation2 + $0x60] sm:$0xff] %vm313_vm0, %v1159_v6  ;;  %v1160_v16 = vadd.f32 %v975_v12, %v383_v2  ;;  %v1188_v17 = vadd.f32 %v1087_v13, %v411_v3  ;;  %v977_v18 = vpop.f32.mrb[27].mxu0  ;;  %v1089_v19 = vpop.f32.mrb[27].mxu1  ;;  %v387_v4 = vld [vmem:[#allocation2 + $0x88] sm:$0xff] }
 0x14e   : > { %1538 = vst.msk [vmem:[%s2231_s15 + $0x128] sm:$0xff] %vm313_vm0, %v1482_v5  ;;  %v1364_v15 = vmul.f32 %v2209_v28, %v1301_v11  ;;  %1244 = vst.msk [vmem:[#allocation2 + $0x140] sm:$0xff] %vm313_vm0, %v1187_v7  ;;  %v1274_v20 = vld [vmem:[#allocation2 + $0x58] sm:$0xff]  ;;  %v415_v5 = vld [vmem:[#allocation2 + $0x168] sm:$0xff] }
 0x14f   : > { %v1302_v21 = vld [vmem:[#allocation2 + $0x138] sm:$0xff]  ;;  %v1399_v22 = vadd.f32 %v2214_v38, %v1336_v14  ;;  %v1337_v24 = vmul.f32 %v2209_v28, %v1274_v20  ;;  %1217 = vst.msk [vmem:[#allocation2 + $0x68] sm:$0xff] %vm313_vm0, %v1160_v16  ;;  %1245 = vst.msk [vmem:[#allocation2 + $0x148] sm:$0xff] %vm313_vm0, %v1188_v17 }
 0x150   : > { %v1427_v23 = vadd.f32 %v2214_v38, %v1364_v15  ;;  %v1365_v25 = vmul.f32 %v2209_v28, %v1302_v21 }
 0x151   : > { %v1455_v29 = vmax.f32 %v1399_v22, 0.0  ;;  %v1400_v31 = vadd.f32 %v2214_v38, %v1337_v24 }
 0x152   : > { %v1483_v30 = vmax.f32 %v1427_v23, 0.0  ;;  %v1428_v32 = vadd.f32 %v2214_v38, %v1365_v25  ;;  %v980_v33 = vpop.f32.mrb[28].mxu0  ;;  %v1092_v34 = vpop.f32.mrb[28].mxu1 }
 0x153   : > { %1511 = vst.msk [vmem:[%s2231_s15 + $0x50] sm:$0xff] %vm313_vm0, %v1455_v29  ;;  %v1456_v37 = vmax.f32 %v1400_v31, 0.0  ;;  %v1161_v40 = vadd.f32 %v980_v33, %v384_v26  ;;  %v1189_v41 = vadd.f32 %v1092_v34, %v412_v27  ;;  %v982_v42 = vpop.f32.mrb[29].mxu0  ;;  %v1094_v43 = vpop.f32.mrb[29].mxu1  ;;  %v388_v29 = vld [vmem:[#allocation2 + $0x90] sm:$0xff] }
 0x154   : > { %1539 = vst.msk [vmem:[%s2231_s15 + $0x130] sm:$0xff] %vm313_vm0, %v1483_v30  ;;  %v1484_v39 = vmax.f32 %v1428_v32, 0.0  ;;  %v1275_v44 = vld [vmem:[#allocation2 + $0x60] sm:$0xff]  ;;  %v983_v46 = vpop.f32.mrb[30].mxu0  ;;  %v1095_v47 = vpop.f32.mrb[30].mxu1  ;;  %v416_v30 = vld [vmem:[#allocation2 + $0x170] sm:$0xff] }
 0x155   : > { %v1303_v45 = vld [vmem:[#allocation2 + $0x140] sm:$0xff]  ;;  %1512 = vst.msk [vmem:[%s2231_s15 + $0x58] sm:$0xff] %vm313_vm0, %v1456_v37  ;;  %v1338_v48 = vmul.f32 %v2209_v28, %v1275_v44  ;;  %1218 = vst.msk [vmem:[#allocation2 + $0x70] sm:$0xff] %vm313_vm0, %v1161_v40  ;;  %v1162_v50 = vadd.f32 %v983_v46, %v385_v35  ;;  %v1190_v51 = vadd.f32 %v1095_v47, %v413_v36  ;;  %v985_v52 = vpop.f32.mrb[31].mxu0  ;;  %v1097_v53 = vpop.f32.mrb[31].mxu1  ;;  %v389_v37 = vld [vmem:[#allocation2 + $0x98] sm:$0xff] }
 0x156   : > { %1540 = vst.msk [vmem:[%s2231_s15 + $0x138] sm:$0xff] %vm313_vm0, %v1484_v39  ;;  %v1366_v49 = vmul.f32 %v2209_v28, %v1303_v45  ;;  %1246 = vst.msk [vmem:[#allocation2 + $0x150] sm:$0xff] %vm313_vm0, %v1189_v41  ;;  %v1276_v54 = vld [vmem:[#allocation2 + $0x68] sm:$0xff]  ;;  %v417_v39 = vld [vmem:[#allocation2 + $0x178] sm:$0xff] }
 0x157   : > { %v1304_v55 = vld [vmem:[#allocation2 + $0x148] sm:$0xff]  ;;  %v1401_v56 = vadd.f32 %v2214_v38, %v1338_v48  ;;  %v1339_v58 = vmul.f32 %v2209_v28, %v1276_v54  ;;  %1219 = vst.msk [vmem:[#allocation2 + $0x78] sm:$0xff] %vm313_vm0, %v1162_v50  ;;  %1247 = vst.msk [vmem:[#allocation2 + $0x158] sm:$0xff] %vm313_vm0, %v1190_v51 }
 0x158   : > { %v1429_v57 = vadd.f32 %v2214_v38, %v1366_v49  ;;  %v1367_v59 = vmul.f32 %v2209_v28, %v1304_v55 }
 0x159   : > { %v1457_v62 = vmax.f32 %v1401_v56, 0.0  ;;  %v1402_v0 = vadd.f32 %v2214_v38, %v1339_v58 }
 0x15a   : > { %v1485_v63 = vmax.f32 %v1429_v57, 0.0  ;;  %v1430_v1 = vadd.f32 %v2214_v38, %v1367_v59  ;;  %v988_v2 = vpop.f32.mrb[32].mxu0  ;;  %v1100_v3 = vpop.f32.mrb[32].mxu1 }
 0x15b   : > { %1513 = vst.msk [vmem:[%s2231_s15 + $0x60] sm:$0xff] %vm313_vm0, %v1457_v62  ;;  %v1458_v6 = vmax.f32 %v1402_v0, 0.0  ;;  %v1163_v8 = vadd.f32 %v988_v2, %v386_v60  ;;  %v1191_v9 = vadd.f32 %v1100_v3, %v414_v61  ;;  %v990_v10 = vpop.f32.mrb[33].mxu0  ;;  %v1102_v11 = vpop.f32.mrb[33].mxu1  ;;  %v390_v62 = vld [vmem:[#allocation2 + $0xa0] sm:$0xff] }
 0x15c   : > { %1541 = vst.msk [vmem:[%s2231_s15 + $0x140] sm:$0xff] %vm313_vm0, %v1485_v63  ;;  %v1486_v7 = vmax.f32 %v1430_v1, 0.0  ;;  %v1277_v12 = vld [vmem:[#allocation2 + $0x70] sm:$0xff]  ;;  %v991_v14 = vpop.f32.mrb[34].mxu0  ;;  %v1103_v15 = vpop.f32.mrb[34].mxu1  ;;  %v418_v63 = vld [vmem:[#allocation2 + $0x180] sm:$0xff] }
 0x15d   : > { %v1305_v13 = vld [vmem:[#allocation2 + $0x150] sm:$0xff]  ;;  %1514 = vst.msk [vmem:[%s2231_s15 + $0x68] sm:$0xff] %vm313_vm0, %v1458_v6  ;;  %v1340_v16 = vmul.f32 %v2209_v28, %v1277_v12  ;;  %1220 = vst.msk [vmem:[#allocation2 + $0x80] sm:$0xff] %vm313_vm0, %v1163_v8  ;;  %v1164_v18 = vadd.f32 %v991_v14, %v387_v4  ;;  %v1192_v19 = vadd.f32 %v1103_v15, %v415_v5  ;;  %v993_v20 = vpop.f32.mrb[35].mxu0  ;;  %v1105_v21 = vpop.f32.mrb[35].mxu1  ;;  %v391_v6 = vld [vmem:[#allocation2 + $0xa8] sm:$0xff] }
 0x15e   : > { %1542 = vst.msk [vmem:[%s2231_s15 + $0x148] sm:$0xff] %vm313_vm0, %v1486_v7  ;;  %v1368_v17 = vmul.f32 %v2209_v28, %v1305_v13  ;;  %1248 = vst.msk [vmem:[#allocation2 + $0x160] sm:$0xff] %vm313_vm0, %v1191_v9  ;;  %v1278_v22 = vld [vmem:[#allocation2 + $0x78] sm:$0xff]  ;;  %v419_v7 = vld [vmem:[#allocation2 + $0x188] sm:$0xff] }
 0x15f   : > { %v1306_v23 = vld [vmem:[#allocation2 + $0x158] sm:$0xff]  ;;  %v1403_v24 = vadd.f32 %v2214_v38, %v1340_v16  ;;  %v1341_v26 = vmul.f32 %v2209_v28, %v1278_v22  ;;  %1221 = vst.msk [vmem:[#allocation2 + $0x88] sm:$0xff] %vm313_vm0, %v1164_v18  ;;  %1249 = vst.msk [vmem:[#allocation2 + $0x168] sm:$0xff] %vm313_vm0, %v1192_v19 }
 0x160   : > { %v1431_v25 = vadd.f32 %v2214_v38, %v1368_v17  ;;  %v1369_v27 = vmul.f32 %v2209_v28, %v1306_v23 }
 0x161   : > { %v1459_v31 = vmax.f32 %v1403_v24, 0.0  ;;  %v1404_v33 = vadd.f32 %v2214_v38, %v1341_v26 }
 0x162   : > { %v1487_v32 = vmax.f32 %v1431_v25, 0.0  ;;  %v1432_v34 = vadd.f32 %v2214_v38, %v1369_v27  ;;  %v996_v35 = vpop.f32.mrb[36].mxu0  ;;  %v1108_v36 = vpop.f32.mrb[36].mxu1 }
 0x163   : > { %1515 = vst.msk [vmem:[%s2231_s15 + $0x70] sm:$0xff] %vm313_vm0, %v1459_v31  ;;  %v1460_v40 = vmax.f32 %v1404_v33, 0.0  ;;  %v1165_v42 = vadd.f32 %v996_v35, %v388_v29  ;;  %v1193_v43 = vadd.f32 %v1108_v36, %v416_v30  ;;  %v998_v44 = vpop.f32.mrb[37].mxu0  ;;  %v1110_v45 = vpop.f32.mrb[37].mxu1  ;;  %v392_v31 = vld [vmem:[#allocation2 + $0xb0] sm:$0xff] }
 0x164   : > { %1543 = vst.msk [vmem:[%s2231_s15 + $0x150] sm:$0xff] %vm313_vm0, %v1487_v32  ;;  %v1488_v41 = vmax.f32 %v1432_v34, 0.0  ;;  %v1279_v46 = vld [vmem:[#allocation2 + $0x80] sm:$0xff]  ;;  %v999_v48 = vpop.f32.mrb[38].mxu0  ;;  %v1111_v49 = vpop.f32.mrb[38].mxu1  ;;  %v420_v32 = vld [vmem:[#allocation2 + $0x190] sm:$0xff] }
 0x165   : > { %v1307_v47 = vld [vmem:[#allocation2 + $0x160] sm:$0xff]  ;;  %1516 = vst.msk [vmem:[%s2231_s15 + $0x78] sm:$0xff] %vm313_vm0, %v1460_v40  ;;  %v1342_v50 = vmul.f32 %v2209_v28, %v1279_v46  ;;  %1222 = vst.msk [vmem:[#allocation2 + $0x90] sm:$0xff] %vm313_vm0, %v1165_v42  ;;  %v1166_v52 = vadd.f32 %v999_v48, %v389_v37  ;;  %v1194_v53 = vadd.f32 %v1111_v49, %v417_v39  ;;  %v1001_v54 = vpop.f32.mrb[39].mxu0  ;;  %v1113_v55 = vpop.f32.mrb[39].mxu1  ;;  %v393_v40 = vld [vmem:[#allocation2 + $0xb8] sm:$0xff] }
 0x166   : > { %1544 = vst.msk [vmem:[%s2231_s15 + $0x158] sm:$0xff] %vm313_vm0, %v1488_v41  ;;  %v1370_v51 = vmul.f32 %v2209_v28, %v1307_v47  ;;  %1250 = vst.msk [vmem:[#allocation2 + $0x170] sm:$0xff] %vm313_vm0, %v1193_v43  ;;  %v1280_v56 = vld [vmem:[#allocation2 + $0x88] sm:$0xff]  ;;  %v421_v41 = vld [vmem:[#allocation2 + $0x198] sm:$0xff] }
 0x167   : > { %v1308_v57 = vld [vmem:[#allocation2 + $0x168] sm:$0xff]  ;;  %v1405_v58 = vadd.f32 %v2214_v38, %v1342_v50  ;;  %v1343_v60 = vmul.f32 %v2209_v28, %v1280_v56  ;;  %1223 = vst.msk [vmem:[#allocation2 + $0x98] sm:$0xff] %vm313_vm0, %v1166_v52  ;;  %1251 = vst.msk [vmem:[#allocation2 + $0x178] sm:$0xff] %vm313_vm0, %v1194_v53 }
 0x168   : > { %v1433_v59 = vadd.f32 %v2214_v38, %v1370_v51  ;;  %v1371_v61 = vmul.f32 %v2209_v28, %v1308_v57 }
 0x169   : > { %v1461_v0 = vmax.f32 %v1405_v58, 0.0  ;;  %v1406_v2 = vadd.f32 %v2214_v38, %v1343_v60 }
 0x16a   : > { %v1489_v1 = vmax.f32 %v1433_v59, 0.0  ;;  %v1434_v3 = vadd.f32 %v2214_v38, %v1371_v61  ;;  %v1004_v4 = vpop.f32.mrb[40].mxu0  ;;  %v1116_v5 = vpop.f32.mrb[40].mxu1 }
 0x16b   : > { %1517 = vst.msk [vmem:[%s2231_s15 + $0x80] sm:$0xff] %vm313_vm0, %v1461_v0  ;;  %v1462_v8 = vmax.f32 %v1406_v2, 0.0  ;;  %v1167_v10 = vadd.f32 %v1004_v4, %v390_v62  ;;  %v1195_v11 = vadd.f32 %v1116_v5, %v418_v63  ;;  %v1006_v12 = vpop.f32.mrb[41].mxu0  ;;  %v1118_v13 = vpop.f32.mrb[41].mxu1  ;;  %v394_v0 = vld [vmem:[#allocation2 + $0xc0] sm:$0xff] }
 0x16c   : > { %1545 = vst.msk [vmem:[%s2231_s15 + $0x160] sm:$0xff] %vm313_vm0, %v1489_v1  ;;  %v1490_v9 = vmax.f32 %v1434_v3, 0.0  ;;  %v1281_v14 = vld [vmem:[#allocation2 + $0x90] sm:$0xff]  ;;  %v1007_v16 = vpop.f32.mrb[42].mxu0  ;;  %v1119_v17 = vpop.f32.mrb[42].mxu1  ;;  %v422_v1 = vld [vmem:[#allocation2 + $0x1a0] sm:$0xff] }
 0x16d   : > { %v1309_v15 = vld [vmem:[#allocation2 + $0x170] sm:$0xff]  ;;  %1518 = vst.msk [vmem:[%s2231_s15 + $0x88] sm:$0xff] %vm313_vm0, %v1462_v8  ;;  %v1344_v18 = vmul.f32 %v2209_v28, %v1281_v14  ;;  %1224 = vst.msk [vmem:[#allocation2 + $0xa0] sm:$0xff] %vm313_vm0, %v1167_v10  ;;  %v1168_v20 = vadd.f32 %v1007_v16, %v391_v6  ;;  %v1196_v21 = vadd.f32 %v1119_v17, %v419_v7  ;;  %v1009_v22 = vpop.f32.mrb[43].mxu0  ;;  %v1121_v23 = vpop.f32.mrb[43].mxu1  ;;  %v395_v8 = vld [vmem:[#allocation2 + $0xc8] sm:$0xff] }
 0x16e   : > { %1546 = vst.msk [vmem:[%s2231_s15 + $0x168] sm:$0xff] %vm313_vm0, %v1490_v9  ;;  %v1372_v19 = vmul.f32 %v2209_v28, %v1309_v15  ;;  %1252 = vst.msk [vmem:[#allocation2 + $0x180] sm:$0xff] %vm313_vm0, %v1195_v11  ;;  %v1282_v24 = vld [vmem:[#allocation2 + $0x98] sm:$0xff]  ;;  %v423_v9 = vld [vmem:[#allocation2 + $0x1a8] sm:$0xff] }
 0x16f   : > { %v1310_v25 = vld [vmem:[#allocation2 + $0x178] sm:$0xff]  ;;  %v1407_v26 = vadd.f32 %v2214_v38, %v1344_v18  ;;  %v1345_v29 = vmul.f32 %v2209_v28, %v1282_v24  ;;  %1225 = vst.msk [vmem:[#allocation2 + $0xa8] sm:$0xff] %vm313_vm0, %v1168_v20  ;;  %1253 = vst.msk [vmem:[#allocation2 + $0x188] sm:$0xff] %vm313_vm0, %v1196_v21 }
 0x170   : > { %v1435_v27 = vadd.f32 %v2214_v38, %v1372_v19  ;;  %v1373_v30 = vmul.f32 %v2209_v28, %v1310_v25 }
 0x171   : > { %v1463_v33 = vmax.f32 %v1407_v26, 0.0  ;;  %v1408_v35 = vadd.f32 %v2214_v38, %v1345_v29 }
 0x172   : > { %v1491_v34 = vmax.f32 %v1435_v27, 0.0  ;;  %v1436_v36 = vadd.f32 %v2214_v38, %v1373_v30  ;;  %v1012_v37 = vpop.f32.mrb[44].mxu0  ;;  %v1124_v39 = vpop.f32.mrb[44].mxu1 }
 0x173   : > { %1519 = vst.msk [vmem:[%s2231_s15 + $0x90] sm:$0xff] %vm313_vm0, %v1463_v33  ;;  %v1464_v42 = vmax.f32 %v1408_v35, 0.0  ;;  %v1169_v44 = vadd.f32 %v1012_v37, %v392_v31  ;;  %v1197_v45 = vadd.f32 %v1124_v39, %v420_v32  ;;  %v1014_v46 = vpop.f32.mrb[45].mxu0  ;;  %v1126_v47 = vpop.f32.mrb[45].mxu1  ;;  %v396_v33 = vld [vmem:[#allocation2 + $0xd0] sm:$0xff] }
 0x174   : > { %1547 = vst.msk [vmem:[%s2231_s15 + $0x170] sm:$0xff] %vm313_vm0, %v1491_v34  ;;  %v1492_v43 = vmax.f32 %v1436_v36, 0.0  ;;  %v1283_v48 = vld [vmem:[#allocation2 + $0xa0] sm:$0xff]  ;;  %v1015_v50 = vpop.f32.mrb[46].mxu0  ;;  %v1127_v51 = vpop.f32.mrb[46].mxu1  ;;  %v424_v34 = vld [vmem:[#allocation2 + $0x1b0] sm:$0xff] }
 0x175   : > { %v1311_v49 = vld [vmem:[#allocation2 + $0x180] sm:$0xff]  ;;  %1520 = vst.msk [vmem:[%s2231_s15 + $0x98] sm:$0xff] %vm313_vm0, %v1464_v42  ;;  %v1346_v52 = vmul.f32 %v2209_v28, %v1283_v48  ;;  %1226 = vst.msk [vmem:[#allocation2 + $0xb0] sm:$0xff] %vm313_vm0, %v1169_v44  ;;  %v1170_v54 = vadd.f32 %v1015_v50, %v393_v40  ;;  %v1198_v55 = vadd.f32 %v1127_v51, %v421_v41  ;;  %v1017_v56 = vpop.f32.mrb[47].mxu0  ;;  %v1129_v57 = vpop.f32.mrb[47].mxu1  ;;  %v397_v42 = vld [vmem:[#allocation2 + $0xd8] sm:$0xff] }
 0x176   : > { %1548 = vst.msk [vmem:[%s2231_s15 + $0x178] sm:$0xff] %vm313_vm0, %v1492_v43  ;;  %v1374_v53 = vmul.f32 %v2209_v28, %v1311_v49  ;;  %1254 = vst.msk [vmem:[#allocation2 + $0x190] sm:$0xff] %vm313_vm0, %v1197_v45  ;;  %v1284_v58 = vld [vmem:[#allocation2 + $0xa8] sm:$0xff]  ;;  %v425_v43 = vld [vmem:[#allocation2 + $0x1b8] sm:$0xff] }
 0x177   : > { %v1312_v59 = vld [vmem:[#allocation2 + $0x188] sm:$0xff]  ;;  %v1409_v60 = vadd.f32 %v2214_v38, %v1346_v52  ;;  %v1347_v62 = vmul.f32 %v2209_v28, %v1284_v58  ;;  %1227 = vst.msk [vmem:[#allocation2 + $0xb8] sm:$0xff] %vm313_vm0, %v1170_v54  ;;  %1255 = vst.msk [vmem:[#allocation2 + $0x198] sm:$0xff] %vm313_vm0, %v1198_v55 }
 0x178   : > { %v1437_v61 = vadd.f32 %v2214_v38, %v1374_v53  ;;  %v1375_v63 = vmul.f32 %v2209_v28, %v1312_v59 }
 0x179   : > { %v1465_v2 = vmax.f32 %v1409_v60, 0.0  ;;  %v1410_v4 = vadd.f32 %v2214_v38, %v1347_v62 }
 0x17a   : > { %v1493_v3 = vmax.f32 %v1437_v61, 0.0  ;;  %v1438_v5 = vadd.f32 %v2214_v38, %v1375_v63  ;;  %v1020_v6 = vpop.f32.mrb[48].mxu0  ;;  %v1132_v7 = vpop.f32.mrb[48].mxu1 }
 0x17b   : > { %1521 = vst.msk [vmem:[%s2231_s15 + $0xa0] sm:$0xff] %vm313_vm0, %v1465_v2  ;;  %v1466_v10 = vmax.f32 %v1410_v4, 0.0  ;;  %v1171_v12 = vadd.f32 %v1020_v6, %v394_v0  ;;  %v1199_v13 = vadd.f32 %v1132_v7, %v422_v1  ;;  %v1022_v14 = vpop.f32.mrb[49].mxu0  ;;  %v1134_v15 = vpop.f32.mrb[49].mxu1 }
 0x17c   : > { %1549 = vst.msk [vmem:[%s2231_s15 + $0x180] sm:$0xff] %vm313_vm0, %v1493_v3  ;;  %v1494_v11 = vmax.f32 %v1438_v5, 0.0  ;;  %v1285_v16 = vld [vmem:[#allocation2 + $0xb0] sm:$0xff]  ;;  %v1023_v18 = vpop.f32.mrb[50].mxu0  ;;  %v1135_v19 = vpop.f32.mrb[50].mxu1 }
 0x17d   : > { %v1313_v17 = vld [vmem:[#allocation2 + $0x190] sm:$0xff]  ;;  %1522 = vst.msk [vmem:[%s2231_s15 + $0xa8] sm:$0xff] %vm313_vm0, %v1466_v10  ;;  %v1348_v20 = vmul.f32 %v2209_v28, %v1285_v16  ;;  %1228 = vst.msk [vmem:[#allocation2 + $0xc0] sm:$0xff] %vm313_vm0, %v1171_v12  ;;  %v1172_v22 = vadd.f32 %v1023_v18, %v395_v8  ;;  %v1200_v23 = vadd.f32 %v1135_v19, %v423_v9  ;;  %v1025_v24 = vpop.f32.mrb[51].mxu0  ;;  %v1137_v25 = vpop.f32.mrb[51].mxu1 }
 0x17e   : > { %1550 = vst.msk [vmem:[%s2231_s15 + $0x188] sm:$0xff] %vm313_vm0, %v1494_v11  ;;  %v1376_v21 = vmul.f32 %v2209_v28, %v1313_v17  ;;  %1256 = vst.msk [vmem:[#allocation2 + $0x1a0] sm:$0xff] %vm313_vm0, %v1199_v13  ;;  %v1286_v26 = vld [vmem:[#allocation2 + $0xb8] sm:$0xff]  ;;  %v1930_v13 = vld [vmem:[%s2509_s3] ss:$0 sm:$0xff] }
 0x17f   : > { %v1314_v27 = vld [vmem:[#allocation2 + $0x198] sm:$0xff]  ;;  %v1411_v29 = vadd.f32 %v2214_v38, %v1348_v20  ;;  %v1349_v31 = vmul.f32 %v2209_v28, %v1286_v26  ;;  %1229 = vst.msk [vmem:[#allocation2 + $0xc8] sm:$0xff] %vm313_vm0, %v1172_v22  ;;  %1257 = vst.msk [vmem:[#allocation2 + $0x1a8] sm:$0xff] %vm313_vm0, %v1200_v23 }
 0x180   : > { %v1439_v30 = vadd.f32 %v2214_v38, %v1376_v21  ;;  %v1377_v32 = vmul.f32 %v2209_v28, %v1314_v27 }
 0x181   : > { %v1467_v35 = vmax.f32 %v1411_v29, 0.0  ;;  %v1412_v37 = vadd.f32 %v2214_v38, %v1349_v31 }
 0x182   : > { %v1495_v36 = vmax.f32 %v1439_v30, 0.0  ;;  %v1440_v39 = vadd.f32 %v2214_v38, %v1377_v32  ;;  %v1028_v40 = vpop.f32.mrb[52].mxu0  ;;  %v1140_v41 = vpop.f32.mrb[52].mxu1 }
 0x183   : > { %1523 = vst.msk [vmem:[%s2231_s15 + $0xb0] sm:$0xff] %vm313_vm0, %v1467_v35  ;;  %v1468_v44 = vmax.f32 %v1412_v37, 0.0  ;;  %v1173_v46 = vadd.f32 %v1028_v40, %v396_v33  ;;  %v1201_v47 = vadd.f32 %v1140_v41, %v424_v34  ;;  %v1030_v48 = vpop.f32.mrb[53].mxu0  ;;  %v1142_v49 = vpop.f32.mrb[53].mxu1 }
 0x184   : > { %1551 = vst.msk [vmem:[%s2231_s15 + $0x190] sm:$0xff] %vm313_vm0, %v1495_v36  ;;  %v1496_v45 = vmax.f32 %v1440_v39, 0.0  ;;  %v1287_v50 = vld [vmem:[#allocation2 + $0xc0] sm:$0xff]  ;;  %v1031_v52 = vpop.f32.mrb[54].mxu0  ;;  %v1143_v53 = vpop.f32.mrb[54].mxu1 }
 0x185   : > { %v1315_v51 = vld [vmem:[#allocation2 + $0x1a0] sm:$0xff]  ;;  %1524 = vst.msk [vmem:[%s2231_s15 + $0xb8] sm:$0xff] %vm313_vm0, %v1468_v44  ;;  %v1350_v54 = vmul.f32 %v2209_v28, %v1287_v50  ;;  %1230 = vst.msk [vmem:[#allocation2 + $0xd0] sm:$0xff] %vm313_vm0, %v1173_v46  ;;  %v1174_v56 = vadd.f32 %v1031_v52, %v397_v42  ;;  %v1202_v57 = vadd.f32 %v1143_v53, %v425_v43  ;;  %v1033_v58 = vpop.f32.mrb[55].mxu0  ;;  %v1145_v59 = vpop.f32.mrb[55].mxu1 }
 0x186   : > { %1552 = vst.msk [vmem:[%s2231_s15 + $0x198] sm:$0xff] %vm313_vm0, %v1496_v45  ;;  %v1378_v55 = vmul.f32 %v2209_v28, %v1315_v51  ;;  %1258 = vst.msk [vmem:[#allocation2 + $0x1b0] sm:$0xff] %vm313_vm0, %v1201_v47  ;;  %v1288_v60 = vld [vmem:[#allocation2 + $0xc8] sm:$0xff] }
 0x187   : > { %v1316_v61 = vld [vmem:[#allocation2 + $0x1a8] sm:$0xff]  ;;  %v1413_v62 = vadd.f32 %v2214_v38, %v1350_v54  ;;  %v1351_v0 = vmul.f32 %v2209_v28, %v1288_v60  ;;  %1231 = vst.msk [vmem:[#allocation2 + $0xd8] sm:$0xff] %vm313_vm0, %v1174_v56  ;;  %1259 = vst.msk [vmem:[#allocation2 + $0x1b8] sm:$0xff] %vm313_vm0, %v1202_v57 }
 0x188   : > { %v1441_v63 = vadd.f32 %v2214_v38, %v1378_v55  ;;  %v1379_v1 = vmul.f32 %v2209_v28, %v1316_v61  ;;  %v1929_v28 = vld [vmem:[%s2508_s2] ss:$0 sm:$0xff] }
 0x189   : > { %v1469_v2 = vmax.f32 %v1413_v62, 0.0  ;;  %v1414_v4 = vadd.f32 %v2214_v38, %v1351_v0 }
 0x18a   : > { %v1497_v3 = vmax.f32 %v1441_v63, 0.0  ;;  %v1442_v5 = vadd.f32 %v2214_v38, %v1379_v1 }
 0x18b   : > { %1525 = vst.msk [vmem:[%s2231_s15 + $0xc0] sm:$0xff] %vm313_vm0, %v1469_v2  ;;  %v1470_v6 = vmax.f32 %v1414_v4, 0.0 }
 0x18c   : > { %1553 = vst.msk [vmem:[%s2231_s15 + $0x1a0] sm:$0xff] %vm313_vm0, %v1497_v3  ;;  %v1498_v7 = vmax.f32 %v1442_v5, 0.0  ;;  %v1289_v8 = vld [vmem:[#allocation2 + $0xd0] sm:$0xff] }
 0x18d   : > { %v1317_v9 = vld [vmem:[#allocation2 + $0x1b0] sm:$0xff]  ;;  %1526 = vst.msk [vmem:[%s2231_s15 + $0xc8] sm:$0xff] %vm313_vm0, %v1470_v6  ;;  %v1352_v10 = vmul.f32 %v1929_v28, %v1289_v8 }
 0x18e   : > { %1554 = vst.msk [vmem:[%s2231_s15 + $0x1a8] sm:$0xff] %vm313_vm0, %v1498_v7  ;;  %v1380_v38 = vmul.f32 %v1929_v28, %v1317_v9  ;;  %v1290_v11 = vld [vmem:[#allocation2 + $0xd8] sm:$0xff] }
 0x18f   : > { %v1318_v12 = vld [vmem:[#allocation2 + $0x1b8] sm:$0xff]  ;;  %v1415_v14 = vadd.f32 %v1930_v13, %v1352_v10  ;;  %v1353_v16 = vmul.f32 %v1929_v28, %v1290_v11 }
 0x190   : > { %v1443_v15 = vadd.f32 %v1930_v13, %v1380_v38  ;;  %v1381_v17 = vmul.f32 %v1929_v28, %v1318_v12 }
 0x191   : > { %v1471_v18 = vmax.f32 %v1415_v14, 0.0  ;;  %v1416_v20 = vadd.f32 %v1930_v13, %v1353_v16 }
 0x192   : > { %v1499_v19 = vmax.f32 %v1443_v15, 0.0  ;;  %v1444_v21 = vadd.f32 %v1930_v13, %v1381_v17 }
 0x193   : > { %1527 = vst.msk [vmem:[%s2231_s15 + $0xd0] sm:$0xff] %vm313_vm0, %v1471_v18  ;;  %v1472_v22 = vmax.f32 %v1416_v20, 0.0 }
 0x194   : > { %1555 = vst.msk [vmem:[%s2231_s15 + $0x1b0] sm:$0xff] %vm313_vm0, %v1499_v19  ;;  %v1500_v23 = vmax.f32 %v1444_v21, 0.0 }
 0x195   : > { %1528 = vst.msk [vmem:[%s2231_s15 + $0xd8] sm:$0xff] %vm313_vm0, %v1472_v22 }
 0x196   : > { %1556 = vst.msk [vmem:[%s2231_s15 + $0x1b8] sm:$0xff] %vm313_vm0, %v1500_v23 }
 0x197 PF: > { %s14_s17 = sadd.s32 1, %s1953_s17   ;;  %s2511_s15 = smov %s1949_s16 }
 0x198   : > { %p11_p5 = scmp.ge.s32.totalorder %s14_s17, 30   ;;  %s2512_s16 = smov %s2514_s18 }
 0x19a   :  { %13 = sbr.rel (!%p11_p5) target bundleno = 2 (0x2), region = 83 }

</bundles_post_ra>
